<compile_context>
chip_gen: v5e
topology: v5e:2x2
jax: 0.10.0
libtpu: 0.0.40
codegen_flags: <defaults>
</compile_context>

<pallas_src>
import jax
import jax.numpy as jnp
from jax.experimental import pallas as pl
from jax.experimental.pallas import tpu as pltpu

# ---- small-shape config (structurally matches handout/img_classifier.py) ----
IMG_SIZE = (16, 16)          # original: (256, 256)
IN_CH = 3
HIDDEN = 512
NUM_LABELS = 3
BATCH = 2

IN_FEATURES = IMG_SIZE[0] * IMG_SIZE[1] * IN_CH   # = 768 (original: 196608)
OUT_PAD = 128          # lane-dense logits slab; real 3 labels sliced in wrapper
SUBLANE = 16           # bf16 packs 16 sublanes/vreg -> pad batch rows to 16
N_COL_BLOCKS = 2       # split W1's 512 output cols into 2 "parallel" blocks (v7x)
COLS = HIDDEN // N_COL_BLOCKS          # 256, lane-aligned
B_PAD_NOMINAL = 16     # nominal padded batch used for the VMEM tile derivation


def _round_up(x, m):
    return ((x + m - 1) // m) * m


def _vmem_budget_bytes():
    """Per-generation VMEM budget with headroom (~48 MiB v7x, ~96 MiB v5e/v6e)."""
    try:
        cap = int(pltpu.get_tpu_info().vmem_capacity_bytes)
    except Exception:
        cap = 0
    if cap <= 0:
        cap = 64 * 1024 * 1024          # v7x-safe fallback (64 MiB physical / TC)
    return (cap * 3) // 4


def _choose_tile_k(in_features, cols, b_pad, vmem_budget):
    """Largest double-buffered W1 K-tile fitting the VMEM budget, capped at 16K.

    Per-core working set: 2x resident x (bf16, constant-index double buffer),
    2x (TILE_K, cols) bf16 W1 tile, plus ~2 MiB for b1 / h1 / f32 acc / scratch.
    At the real shape this yields 8K-16K tiles (12-24 steps/column block) instead
    of 768 tiny 256-row steps, pushing the W1 stream to ~85-95% of HBM roofline.
    """
    x_bytes = 2 * b_pad * _round_up(in_features, 128) * 2      # bf16, 2 buffers
    avail = max(vmem_budget - x_bytes - 2 * 1024 * 1024, 2 * 1024 * 1024)
    tk = avail // (2 * cols * 2)            # 2 buffers * cols * 2 bytes/elem
    tk = min(tk, 16 * 1024, in_features)    # 16K cap keeps step overhead <~7%
    return max(128, (tk // 128) * 128)      # lane-aligned


VMEM_LIMIT = _vmem_budget_bytes()
TILE_K = _choose_tile_k(IN_FEATURES, COLS, B_PAD_NOMINAL, VMEM_LIMIT)
IN_PAD = _round_up(IN_FEATURES, TILE_K)     # zero-pad reduction dim if needed
N_K = IN_PAD // TILE_K


# --------------------------- kernels ---------------------------

def layer1_kernel(x_ref, w1_ref, b1_ref, h1_ref, acc_ref):
    """K-tiled, column-parallel layer 1: h1 = relu(x @ W1 + b1).

    Grid: (N_COL_BLOCKS parallel, N_K arbitrary).
      x_ref  : (B_pad, IN_PAD)   bf16  (fully resident; K-sliced in-kernel)
      w1_ref : (TILE_K, COLS)    bf16  (streamed K tile of this column block)
      b1_ref : (1, COLS)         f32
      h1_ref : (B_pad, COLS)     bf16  (this core's column block of h1)
      acc_ref: (B_pad, COLS)     f32   VMEM accumulator
    """
    k = pl.program_id(1)

    @pl.when(k == 0)
    def _init():
        acc_ref[...] = jnp.zeros_like(acc_ref)

    start = pl.multiple_of(k * TILE_K, TILE_K)
    xk = x_ref[:, pl.ds(start, TILE_K)]
    acc_ref[...] += jnp.dot(xk, w1_ref[...], preferred_element_type=jnp.float32)

    @pl.when(k == pl.num_programs(1) - 1)
    def _finalize():
        h1 = jnp.maximum(acc_ref[...] + b1_ref[...], 0.0)      # bias + ReLU (VPU)
        h1_ref[...] = h1.astype(h1_ref.dtype)


def head_kernel(h1_ref, w2_ref, b2_ref, w3_ref, b3_ref, out_ref):
    """Tiny fused head: logits = relu(h1 @ W2 + b2) @ W3 + b3 (all VMEM-resident)."""
    h2 = jnp.dot(h1_ref[...], w2_ref[...],
                 preferred_element_type=jnp.float32) + b2_ref[...]
    h2 = jnp.maximum(h2, 0.0)
    logits = jnp.dot(h2.astype(w3_ref.dtype), w3_ref[...],
                     preferred_element_type=jnp.float32) + b3_ref[...]
    out_ref[...] = logits.astype(out_ref.dtype)


# --------------------------- host-side wrappers ---------------------------

def prepare_params(params):
    """One-time conversion from torch (out,in) f32 layout to kernel layout.

    Done once at init (NOT per forward): transpose to (in,out), cast weights to
    bf16, zero-pad W1 rows to IN_PAD and layer-3 lanes to OUT_PAD.
    """
    w1, b1, w2, b2, w3, b3 = params
    w1k = jnp.zeros((IN_PAD, HIDDEN), jnp.bfloat16)
    w1k = w1k.at[:IN_FEATURES, :].set(w1.T.astype(jnp.bfloat16))    # (IN_PAD, H)
    w2k = jnp.asarray(w2.T, dtype=jnp.bfloat16)                     # (H, H)
    w3k = jnp.zeros((HIDDEN, OUT_PAD), jnp.bfloat16)
    w3k = w3k.at[:, :NUM_LABELS].set(w3.T.astype(jnp.bfloat16))     # (H, 128)
    b1k = b1.reshape(1, -1).astype(jnp.float32)
    b2k = b2.reshape(1, -1).astype(jnp.float32)
    b3k = jnp.zeros((1, OUT_PAD), jnp.float32).at[:, :NUM_LABELS].set(b3)
    return (w1k, b1k, w2k, b2k, w3k, b3k)


@jax.jit
def neural_network_forward(x_nchw, kernel_params):
    """JAX wrapper reproducing NeuralNetwork.forward semantics."""
    w1k, b1k, w2k, b2k, w3k, b3k = kernel_params
    B = x_nchw.shape[0]
    B_pad = max(SUBLANE, _round_up(B, SUBLANE))

    # nn.Flatten(): flatten all dims except batch (NCHW order), pad rows to a
    # full bf16 sublane tile and the reduction dim to a multiple of TILE_K.
    x_flat = x_nchw.reshape(B, -1).astype(jnp.bfloat16)
    x_flat = jnp.pad(x_flat, ((0, B_pad - B), (0, IN_PAD - IN_FEATURES)))

    l1_flops = 2 * B_pad * IN_PAD * HIDDEN
    l1_bytes = (w1k.size * 2 + x_flat.size * 2 + b1k.size * 4 + B_pad * HIDDEN * 2)

    h1 = pl.pallas_call(
        layer1_kernel,
        out_shape=jax.ShapeDtypeStruct((B_pad, HIDDEN), jnp.bfloat16),
        grid_spec=pltpu.PrefetchScalarGridSpec(
            num_scalar_prefetch=0,
            grid=(N_COL_BLOCKS, N_K),
            in_specs=[
                pl.BlockSpec((B_pad, IN_PAD), lambda j, k: (0, 0)),   # x resident
                pl.BlockSpec((TILE_K, COLS), lambda j, k: (k, j)),    # W1 stream
                pl.BlockSpec((1, COLS), lambda j, k: (0, j)),         # b1 col block
            ],
            out_specs=pl.BlockSpec((B_pad, COLS), lambda j, k: (0, j)),
            scratch_shapes=[pltpu.VMEM((B_pad, COLS), jnp.float32)],
        ),
        compiler_params=pltpu.CompilerParams(
            dimension_semantics=("parallel", "arbitrary"),
            vmem_limit_bytes=VMEM_LIMIT,
        ),
        cost_estimate=pl.CostEstimate(
            flops=l1_flops, transcendentals=0, bytes_accessed=l1_bytes),
    )(x_flat, w1k, b1k)

    out_padded = pl.pallas_call(
        head_kernel,
        out_shape=jax.ShapeDtypeStruct((B_pad, OUT_PAD), jnp.float32),
        cost_estimate=pl.CostEstimate(
            flops=2 * B_pad * (HIDDEN * HIDDEN + HIDDEN * OUT_PAD),
            transcendentals=0,
            bytes_accessed=(w2k.size + w3k.size) * 2
            + B_pad * (HIDDEN * 2 + OUT_PAD * 4)
            + (b2k.size + b3k.size) * 4),
    )(h1, w2k, b2k, w3k, b3k)

    # Slice away the row padding and the lane padding (3 real labels).
    return out_padded[:B, :NUM_LABELS]


def init_params(key):
    """Deterministic parameter init with PyTorch nn.Linear shapes (out, in)."""
    ks = jax.random.split(key, 6)

    def lin(kw, kb, fan_in, fan_out):
        bound = 1.0 / jnp.sqrt(fan_in)
        w = jax.random.uniform(kw, (fan_out, fan_in), jnp.float32, -bound, bound)
        b = jax.random.uniform(kb, (fan_out,), jnp.float32, -bound, bound)
        return w, b

    w1, b1 = lin(ks[0], ks[1], IN_FEATURES, HIDDEN)
    w2, b2 = lin(ks[2], ks[3], HIDDEN, HIDDEN)
    w3, b3 = lin(ks[4], ks[5], HIDDEN, NUM_LABELS)
    return (w1, b1, w2, b2, w3, b3)


if __name__ == "__main__":
    key = jax.random.PRNGKey(0)
    k_x, k_p = jax.random.split(key)

    x = jax.random.normal(k_x, (BATCH, IN_CH, IMG_SIZE[0], IMG_SIZE[1]), jnp.float32)
    torch_params = init_params(k_p)
    kernel_params = prepare_params(torch_params)   # one-time layout/dtype conversion

    logits = neural_network_forward(x, kernel_params)
    logits = jax.block_until_ready(logits)

    # Pure-JAX reference using the SAME bf16 weights / f32 accumulation so the
    # check isolates kernel correctness (not the bf16 quantization choice).
    w1k, b1k, w2k, b2k, w3k, b3k = kernel_params
    xf = x.reshape(BATCH, -1).astype(jnp.bfloat16)
    h1 = jnp.maximum(
        jnp.dot(xf, w1k[:IN_FEATURES], preferred_element_type=jnp.float32) + b1k, 0.0)
    h1 = h1.astype(jnp.bfloat16)
    h2 = jnp.maximum(
        jnp.dot(h1, w2k, preferred_element_type=jnp.float32) + b2k, 0.0)
    ref = (jnp.dot(h2.astype(jnp.bfloat16), w3k, preferred_element_type=jnp.float32)
           + b3k)[:, :NUM_LABELS]

    assert logits.shape == (BATCH, NUM_LABELS)
    assert jnp.allclose(logits, ref, atol=2e-3, rtol=2e-3), (logits, ref)

    print("KERNEL_OK")
</pallas_src>

<mosaic_0001>
module attributes {stable_mosaic.version = 11 : i64} {
  func.func @layer1_kernel(%arg0: i32, %arg1: i32, %arg2: memref<16x768xbf16, #tpu.memory_space<vmem>>, %arg3: memref<768x256xbf16, #tpu.memory_space<vmem>>, %arg4: memref<1x256xf32, #tpu.memory_space<vmem>>, %arg5: memref<16x256xbf16, #tpu.memory_space<vmem>>, %arg6: memref<16x256xf32, #tpu.memory_space<vmem>>) attributes {dimension_semantics = [#tpu.dimension_semantics<parallel>, #tpu.dimension_semantics<arbitrary>], iteration_bounds = array<i64: 2, 1>, scalar_prefetch = 0 : i64, scratch_operands = 1 : i64, tpu.core_type = #tpu.core_type<tc>, window_params = [{pipeline_mode = #tpu.pipeline_mode<synchronous>, transform_indices = @transform_0, window_bounds = array<i64: 16, 768>}, {transform_indices = @transform_1, window_bounds = array<i64: 768, 256>}, {transform_indices = @transform_2, window_bounds = array<i64: 1, 256>}, {transform_indices = @transform_3, window_bounds = array<i64: 16, 256>}]} {
    %c0_i32 = arith.constant 0 : i32
    %0 = arith.cmpi eq, %arg1, %c0_i32 : i32
    %1 = arith.extui %0 : i1 to i32
    %c0_i32_0 = arith.constant 0 : i32
    %2 = arith.cmpi ne, %1, %c0_i32_0 : i32
    scf.if %2 {
      %cst_9 = arith.constant 0.000000e+00 : f32
      %15 = vector.broadcast %cst_9 : f32 to vector<16x256xf32>
      %c0_10 = arith.constant 0 : index
      %c0_11 = arith.constant 0 : index
      %16 = vector.load %arg6[%c0_10, %c0_11] : memref<16x256xf32, #tpu.memory_space<vmem>>, vector<16x256xf32>
      tpu.vector_store %arg6[%c0_10, %c0_11], %15 {strides = array<i32>} : memref<16x256xf32, #tpu.memory_space<vmem>>, vector<16x256xf32>,
    } else {
    }
    %c768_i32 = arith.constant 768 : i32
    %3 = arith.muli %arg1, %c768_i32 : i32
    %4 = tpu.assume_multiple %3, 768 : i32
    %c0 = arith.constant 0 : index
    %5 = arith.index_cast %4 : i32 to index
    %6 = vector.load %arg2[%c0, %5] : memref<16x768xbf16, #tpu.memory_space<vmem>>, vector<16x768xbf16>
    %c0_1 = arith.constant 0 : index
    %c0_2 = arith.constant 0 : index
    %7 = vector.load %arg6[%c0_1, %c0_2] : memref<16x256xf32, #tpu.memory_space<vmem>>, vector<16x256xf32>
    %c0_3 = arith.constant 0 : index
    %c0_4 = arith.constant 0 : index
    %8 = vector.load %arg3[%c0_3, %c0_4] : memref<768x256xbf16, #tpu.memory_space<vmem>>, vector<768x256xbf16>
    %cst = arith.constant dense<0.000000e+00> : vector<16x256xf32>
    %9 = tpu.matmul %6, %8, %cst {dimension_numbers = #tpu.dot_dimension_numbers<[1], [0], [0], [1], [0, 0, 1, 1], [], []>} : vector<16x768xbf16>, vector<768x256xbf16>, vector<16x256xf32> -> vector<16x256xf32>
    %10 = arith.addf %7, %9 : vector<16x256xf32>
    %c0_5 = arith.constant 0 : index
    %c0_6 = arith.constant 0 : index
    %11 = vector.load %arg6[%c0_5, %c0_6] : memref<16x256xf32, #tpu.memory_space<vmem>>, vector<16x256xf32>
    tpu.vector_store %arg6[%c0_5, %c0_6], %10 {strides = array<i32>} : memref<16x256xf32, #tpu.memory_space<vmem>>, vector<16x256xf32>,
    %c0_i32_7 = arith.constant 0 : i32
    %12 = arith.cmpi eq, %arg1, %c0_i32_7 : i32
    %13 = arith.extui %12 : i1 to i32
    %c0_i32_8 = arith.constant 0 : i32
    %14 = arith.cmpi ne, %13, %c0_i32_8 : i32
    scf.if %14 {
      %c0_9 = arith.constant 0 : index
      %c0_10 = arith.constant 0 : index
      %15 = vector.load %arg6[%c0_9, %c0_10] : memref<16x256xf32, #tpu.memory_space<vmem>>, vector<16x256xf32>
      %c0_11 = arith.constant 0 : index
      %c0_12 = arith.constant 0 : index
      %16 = vector.load %arg4[%c0_11, %c0_12] : memref<1x256xf32, #tpu.memory_space<vmem>>, vector<1x256xf32>
      %17 = vector.broadcast %16 : vector<1x256xf32> to vector<16x256xf32>
      %18 = arith.addf %15, %17 : vector<16x256xf32>
      %cst_13 = arith.constant 0.000000e+00 : f32
      %19 = vector.broadcast %cst_13 : f32 to vector<16x256xf32>
      %20 = arith.maximumf %18, %19 : vector<16x256xf32>
      %21 = arith.truncf %20 : vector<16x256xf32> to vector<16x256xbf16>
      %c0_14 = arith.constant 0 : index
      %c0_15 = arith.constant 0 : index
      %22 = vector.load %arg5[%c0_14, %c0_15] : memref<16x256xbf16, #tpu.memory_space<vmem>>, vector<16x256xbf16>
      tpu.vector_store %arg5[%c0_14, %c0_15], %21 {strides = array<i32>} : memref<16x256xbf16, #tpu.memory_space<vmem>>, vector<16x256xbf16>,
    } else {
    }
    return
  }
  func.func @transform_0(%arg0: i32, %arg1: i32) -> (i32, i32) {
    %c0_i32 = arith.constant 0 : i32
    %c0_i32_0 = arith.constant 0 : i32
    %c0_i32_1 = arith.constant 0 : i32
    return %c0_i32, %c0_i32_0 : i32, i32
  }
  func.func @transform_1(%arg0: i32, %arg1: i32) -> (i32, i32) {
    %c0_i32 = arith.constant 0 : i32
    return %arg1, %arg0 : i32, i32
  }
  func.func @transform_2(%arg0: i32, %arg1: i32) -> (i32, i32) {
    %c0_i32 = arith.constant 0 : i32
    %c0_i32_0 = arith.constant 0 : i32
    return %c0_i32, %arg0 : i32, i32
  }
  func.func @transform_3(%arg0: i32, %arg1: i32) -> (i32, i32) {
    %c0_i32 = arith.constant 0 : i32
    %c0_i32_0 = arith.constant 0 : i32
    return %c0_i32, %arg0 : i32, i32
  }
}

module attributes {stable_mosaic.version = 11 : i64} {
  func.func @head_kernel(%arg0: memref<16x512xbf16, #tpu.memory_space<vmem>>, %arg1: memref<512x512xbf16, #tpu.memory_space<vmem>>, %arg2: memref<1x512xf32, #tpu.memory_space<vmem>>, %arg3: memref<512x128xbf16, #tpu.memory_space<vmem>>, %arg4: memref<1x128xf32, #tpu.memory_space<vmem>>, %arg5: memref<16x128xf32, #tpu.memory_space<vmem>>) attributes {dimension_semantics = [], scalar_prefetch = 0 : i64, scratch_operands = 0 : i64, tpu.core_type = #tpu.core_type<tc>} {
    %c0 = arith.constant 0 : index
    %c0_0 = arith.constant 0 : index
    %0 = vector.load %arg0[%c0, %c0_0] : memref<16x512xbf16, #tpu.memory_space<vmem>>, vector<16x512xbf16>
    %c0_1 = arith.constant 0 : index
    %c0_2 = arith.constant 0 : index
    %1 = vector.load %arg1[%c0_1, %c0_2] : memref<512x512xbf16, #tpu.memory_space<vmem>>, vector<512x512xbf16>
    %cst = arith.constant dense<0.000000e+00> : vector<16x512xf32>
    %2 = tpu.matmul %0, %1, %cst {dimension_numbers = #tpu.dot_dimension_numbers<[1], [0], [0], [1], [0, 0, 1, 1], [], []>} : vector<16x512xbf16>, vector<512x512xbf16>, vector<16x512xf32> -> vector<16x512xf32>
    %c0_3 = arith.constant 0 : index
    %c0_4 = arith.constant 0 : index
    %3 = vector.load %arg2[%c0_3, %c0_4] : memref<1x512xf32, #tpu.memory_space<vmem>>, vector<1x512xf32>
    %4 = vector.broadcast %3 : vector<1x512xf32> to vector<16x512xf32>
    %5 = arith.addf %2, %4 : vector<16x512xf32>
    %cst_5 = arith.constant 0.000000e+00 : f32
    %6 = vector.broadcast %cst_5 : f32 to vector<16x512xf32>
    %7 = arith.maximumf %5, %6 : vector<16x512xf32>
    %8 = arith.truncf %7 : vector<16x512xf32> to vector<16x512xbf16>
    %c0_6 = arith.constant 0 : index
    %c0_7 = arith.constant 0 : index
    %9 = vector.load %arg3[%c0_6, %c0_7] : memref<512x128xbf16, #tpu.memory_space<vmem>>, vector<512x128xbf16>
    %cst_8 = arith.constant dense<0.000000e+00> : vector<16x128xf32>
    %10 = tpu.matmul %8, %9, %cst_8 {dimension_numbers = #tpu.dot_dimension_numbers<[1], [0], [0], [1], [0, 0, 1, 1], [], []>} : vector<16x512xbf16>, vector<512x128xbf16>, vector<16x128xf32> -> vector<16x128xf32>
    %c0_9 = arith.constant 0 : index
    %c0_10 = arith.constant 0 : index
    %11 = vector.load %arg4[%c0_9, %c0_10] : memref<1x128xf32, #tpu.memory_space<vmem>>, vector<1x128xf32>
    %12 = vector.broadcast %11 : vector<1x128xf32> to vector<16x128xf32>
    %13 = arith.addf %10, %12 : vector<16x128xf32>
    %c0_11 = arith.constant 0 : index
    %c0_12 = arith.constant 0 : index
    %14 = vector.load %arg5[%c0_11, %c0_12] : memref<16x128xf32, #tpu.memory_space<vmem>>, vector<16x128xf32>
    tpu.vector_store %arg5[%c0_11, %c0_12], %13 {strides = array<i32>} : memref<16x128xf32, #tpu.memory_space<vmem>>, vector<16x128xf32>,
    return
  }
}

</mosaic_0001>

<bundles_post_ra>
// kernel: neural_network_forward.2
= control target key start
LH: loop header
LB: loop body
LE: loop exit
PB: predicated region body
PF: predicated region fallthrough
CT: control target
= control target key end

     0   :  { %8 = vsyncpa [#allocation4], 0  ;;  %s2333_s0 = inlined_call_operand.vmem [shape: bf16[16,768], index: 0, kind: input, shape index: {}]   ;;  %s2334_s1 = inlined_call_operand.hbm [shape: bf16[768,512], index: 1, kind: input, shape index: {}]   ;;  %s2335_s2 = inlined_call_operand.hbm [shape: f32[1,512], index: 2, kind: input, shape index: {}]   ;;  %s2336_s3 = inlined_call_operand.vmem [shape: bf16[16,512], index: 3, kind: output, shape index: {}]  }
   0x1   :  { %10 = vsyncpa [#allocation4 + $0x1], 0 }
   0x2   :  { %11 = vsyncpa [#allocation6], 0 }
   0x3   :  { %13 = vsyncpa [#allocation6 + $0x1], 0  ;;  %s1954_s12 = smov 0   ;;  %s1956_s13 = smov 0  }
   0x4   :  { %s1958_s14 = smov 0   ;;  %s1960_s15 = smov 0  }
   0x5   :  { %s1962_s16 = smov 0   ;;  %s1964_s17 = smov 0  }
   0x6 LB: > { %s1222_s18 = sadd.s32 4294967295, %s1929_s17   ;;  %s31_s19 = sadd.s32 1, %s1925_s16  ;;  %s1929_s17 = sphi %s1964_s17, %s19_s17   ;;  %s1925_s16 = sphi %s1962_s16, %s2345_s16   ;;  %s1921_s15 = sphi %s1960_s15, %s2344_s15   ;;  %s1917_s14 = sphi %s1958_s14, %s2343_s14   ;;  %s1913_s13 = sphi %s1956_s13, %s2342_s13   ;;  %s1909_s12 = sphi %s1954_s12, %s2341_s12  }
   0x7   : > { %p33_p0 = scmp.ge.s32.totalorder %s31_s19, 2  ;;  %s61_s20 = sadd.s32 1, %s1917_s14 }
   0x8   : > { %p68_p1 = scmp.ne.s32.totalorder %s1917_s14, %s1913_s13  ;;  %p69_p2 = scmp.eq.s32.totalorder %s1929_s17, 0 }
   0x9   : > { %s2347_s19 = smov (%p33_p0, %s31_s19), 0  ;;  %p74_p4 = scmp.ne.s32.totalorder %s1913_s13, %s1909_s12 }
   0xa   : > { %p1990_p3 = por %p69_p2, %p68_p1  ;;  %s57_s22 = ssub.s32 %s1925_s16, %s2347_s19 }
   0xb   : > { %p75_p5 = scmp.eq.s32.totalorder %s1222_s18, 0  ;;  %p59_p6 = scmp.eq.s32.totalorder %s57_s22, 0 }
   0xc   : > { %p124_p7 = scmp.eq.s32.totalorder %s1222_s18, 1  ;;  %p1763_p10 = scmp.lt.s32.totalorder %s1929_s17, 2 }
   0xd   : > { %p1997_p8 = por %p75_p5, %p74_p4  ;;  %s2010_s26 = sand.u32 1, %s1917_s14  }
   0xe   : > { %s2002_s24 = scalar_select %p59_p6, %s1917_s14, %s61_s20  }
   0xf   : > { %p2004_p9 = por %p124_p7, %p68_p1  ;;  %s1646_s27 = sshll.u32 %s1925_s16, 3 }
  0x10   : > { %s1750_s28 = smul.u32 768, %s2010_s26  ;;  %s165_s4 = scalar_lea.hbm %s2334_s1, %s1646_s27 }
  0x11   : > { %p2019_p11 = pnand %p1763_p10, %p1990_p3  ;;  %s166_s6 = sshll.u32 %s165_s4, 4  ;;  %s167_s6 = int_to_ptr.hbm [resolvable:$true] %s166_s6 }
  0x12   : > { %s157_s7 = scalar_lea.vmem [#allocation3], %s1750_s28  ;;  %p1230_p12 = scmp.ge.s32.totalorder %s1929_s17, 1 }
  0x13   : > { %s168_s8 = sshll.u32 %s157_s7, 4  ;;  %s154_s9 = scalar_lea.sflag [#allocation4], %s2010_s26  ;;  %s169_s8 = int_to_ptr.vmem [resolvable:$true] %s168_s8 }
  0x14   : > { %s1931_s10 = smov 256   ;;  %s1932_s11 = smov 128  }
  0x15   : > { %s1933_s12 = smov 8   ;;  %p195_p13 = scmp.lt.s32.totalorder %s1929_s17, 3 }
  0x16   : > { %1759 = dma.hbm_to_vmem [thread:$0]  (!%p2019_p11), %s167_s6, 12288, %s169_s8, %s154_s9, %s1931_s10, %s1932_s11, %s1933_s12  }
  0x17   : > { %s1228_s18 = sshll.u32 %s2010_s26, 1  ;;  %s1229_s20 = sshll.u32 %s1925_s16, 1 }
  0x18   : > { %p196_p0 = pnand %p1230_p12, %p195_p13  ;;  %s186_s27 = scalar_lea.hbm %s2335_s2, %s1229_s20 }
  0x19   : > { %s182_s28 = scalar_lea.vmem [#allocation5], %s1228_s18  ;;  %s188_s30 = sshll.u32 %s186_s27, 4  ;;  %s189_s30 = int_to_ptr.hbm [resolvable:$true] %s188_s30 }
  0x1a   : > { %s190_s29 = sshll.u32 %s182_s28, 4  ;;  %s179_s4 = scalar_lea.sflag [#allocation6], %s2010_s26  ;;  %s191_s29 = int_to_ptr.vmem [resolvable:$true] %s190_s29 }
  0x1b   : > { %1762 = dma.hbm_to_vmem [thread:$0]  (!%p2019_p11), %s189_s30, 32, %s191_s29, %s179_s4  }
  0x1c   : > { %199 = sbr.rel (%p196_p0) target bundleno = 296 (0x128), region = 32  ;;  %s2037_s6 = sand.u32 (!%p196_p0), 1, %s1913_s13  }
  0x1d   : > { %s1751_s7 = smul.u32 (!%p196_p0), 768, %s2037_s6  ;;  %s202_s8 = scalar_lea.sflag (!%p196_p0), [#allocation4], %s2037_s6 }
  0x1f   : > { %s2041_s9 = scalar_lea.vmem (!%p196_p0), [#allocation3], %s1751_s7 }
  0x21   : > { %1900 = dma.done.wait (%p1997_p8), %s202_s8, 12288  }
  0x22   : > { %1902 = vsyncadd (%p1997_p8), %s202_s8, 4294955008  ;;  %s1231_s26 = sshll.u32 %s2037_s6, 1  ;;  %s212_s5 = scalar_lea.sflag [#allocation6], %s2037_s6 }
  0x23   : > { %s2049_s10 = scalar_lea.vmem [#allocation5], %s1231_s26 }
  0x24   : > { %1904 = dma.done.wait (%p1997_p8), %s212_s5, 32  }
  0x25   : > { %1906 = vsyncadd (%p1997_p8), %s212_s5, 4294967264  ;;  %v1315_v0 = vld [vmem:[%s2041_s9 + $0x70] sm:$0xf]  ;;  %v1668_v1 = vld [vmem:[%s2041_s9 + $0x74] sm:$0xf0] }
  0x26   : > { %v1379_v2 = vld [vmem:[%s2041_s9 + $0xf0] sm:$0xf]  ;;  %v1316_v3 = vor.u32 %v1668_v1, %v1315_v0  ;;  %v1684_v4 = vld [vmem:[%s2041_s9 + $0xf4] sm:$0xf0]  ;;  %v1307_v11 = vld [vmem:[%s2041_s9 + $0x60] sm:$0xf] }
  0x27   : > { %v1443_v5 = vld [vmem:[%s2041_s9 + $0x170] sm:$0xf]  ;;  %v1700_v6 = vld [vmem:[%s2041_s9 + $0x174] sm:$0xf0]  ;;  %v1380_v7 = vor.u32 %v1684_v4, %v1379_v2  ;;  %v1666_v13 = vld [vmem:[%s2041_s9 + $0x64] sm:$0xf0] }
  0x28   : > { %v1444_v8 = vor.u32 %v1700_v6, %v1443_v5  ;;  %v1507_v9 = vld [vmem:[%s2041_s9 + $0x1f0] sm:$0xf]  ;;  %v1716_v10 = vld [vmem:[%s2041_s9 + $0x1f4] sm:$0xf0]  ;;  %876 = vmatpush.bf16.msra.mxu0 %v1316_v3  ;;  %v1371_v14 = vld [vmem:[%s2041_s9 + $0xe0] sm:$0xf]  ;;  %v1308_v16 = vor.u32 %v1666_v13, %v1307_v11 }
  0x29   : > { %v1508_v12 = vor.u32 %v1716_v10, %v1507_v9  ;;  %v1682_v15 = vld [vmem:[%s2041_s9 + $0xe4] sm:$0xf0]  ;;  %890 = vmatpush.bf16.msra.mxu1 %v1380_v7  ;;  %v1435_v18 = vld [vmem:[%s2041_s9 + $0x160] sm:$0xf]  ;;  %v1299_v23 = vld [vmem:[%s2041_s9 + $0x50] sm:$0xf] }
  0x2a   : > { %904 = vmatpush.bf16.msra.mxu2 %v1444_v8  ;;  %v1372_v17 = vor.u32 %v1682_v15, %v1371_v14  ;;  %v1698_v19 = vld [vmem:[%s2041_s9 + $0x164] sm:$0xf0]  ;;  %v1499_v20 = vld [vmem:[%s2041_s9 + $0x1e0] sm:$0xf]  ;;  %v1664_v24 = vld [vmem:[%s2041_s9 + $0x54] sm:$0xf0] }
  0x2b   : > { %918 = vmatpush.bf16.msra.mxu3 %v1508_v12  ;;  %v1436_v21 = vor.u32 %v1698_v19, %v1435_v18  ;;  %v1714_v22 = vld [vmem:[%s2041_s9 + $0x1e4] sm:$0xf0]  ;;  %v1363_v26 = vld [vmem:[%s2041_s9 + $0xd0] sm:$0xf]  ;;  %v1680_v27 = vld [vmem:[%s2041_s9 + $0xd4] sm:$0xf0]  ;;  %v1300_v29 = vor.u32 %v1664_v24, %v1299_v23 }
  0x2c   : > { %v1500_v25 = vor.u32 %v1714_v22, %v1499_v20  ;;  %v1427_v28 = vld [vmem:[%s2041_s9 + $0x150] sm:$0xf]  ;;  %877 = vmatpush.bf16.msra.mxu0 %v1308_v16  ;;  %v1696_v30 = vld [vmem:[%s2041_s9 + $0x154] sm:$0xf0]  ;;  %v1364_v33 = vor.u32 %v1680_v27, %v1363_v26  ;;  %v1291_v35 = vld [vmem:[%s2041_s9 + $0x40] sm:$0xf] }
  0x2d   : > { %v1491_v31 = vld [vmem:[%s2041_s9 + $0x1d0] sm:$0xf]  ;;  %v1712_v32 = vld [vmem:[%s2041_s9 + $0x1d4] sm:$0xf0]  ;;  %891 = vmatpush.bf16.msra.mxu1 %v1372_v17  ;;  %v1428_v34 = vor.u32 %v1696_v30, %v1427_v28  ;;  %v1662_v36 = vld [vmem:[%s2041_s9 + $0x44] sm:$0xf0] }
  0x2e   : > { %905 = vmatpush.bf16.msra.mxu2 %v1436_v21  ;;  %v1355_v37 = vld [vmem:[%s2041_s9 + $0xc0] sm:$0xf]  ;;  %v1492_v38 = vor.u32 %v1712_v32, %v1491_v31  ;;  %v1678_v39 = vld [vmem:[%s2041_s9 + $0xc4] sm:$0xf0]  ;;  %v1292_v44 = vor.u32 %v1662_v36, %v1291_v35  ;;  %v1283_v47 = vld [vmem:[%s2041_s9 + $0x30] sm:$0xf] }
  0x2f   : > { %919 = vmatpush.bf16.msra.mxu3 %v1500_v25  ;;  %v1419_v40 = vld [vmem:[%s2041_s9 + $0x140] sm:$0xf]  ;;  %v1694_v41 = vld [vmem:[%s2041_s9 + $0x144] sm:$0xf0]  ;;  %v1356_v45 = vor.u32 %v1678_v39, %v1355_v37  ;;  %v1660_v48 = vld [vmem:[%s2041_s9 + $0x34] sm:$0xf0] }
  0x30   : > { %v1483_v42 = vld [vmem:[%s2041_s9 + $0x1c0] sm:$0xf]  ;;  %v1710_v43 = vld [vmem:[%s2041_s9 + $0x1c4] sm:$0xf0]  ;;  %878 = vmatpush.bf16.msra.mxu0 %v1300_v29  ;;  %v1420_v46 = vor.u32 %v1694_v41, %v1419_v40  ;;  %v1347_v49 = vld [vmem:[%s2041_s9 + $0xb0] sm:$0xf]  ;;  %v1284_v56 = vor.u32 %v1660_v48, %v1283_v47 }
  0x31   : > { %892 = vmatpush.bf16.msra.mxu1 %v1364_v33  ;;  %v1484_v50 = vor.u32 %v1710_v43, %v1483_v42  ;;  %v1676_v51 = vld [vmem:[%s2041_s9 + $0xb4] sm:$0xf0]  ;;  %v1411_v52 = vld [vmem:[%s2041_s9 + $0x130] sm:$0xf]  ;;  %v1275_v59 = vld [vmem:[%s2041_s9 + $0x20] sm:$0xf] }
  0x32   : > { %906 = vmatpush.bf16.msra.mxu2 %v1428_v34  ;;  %v1692_v53 = vld [vmem:[%s2041_s9 + $0x134] sm:$0xf0]  ;;  %v1475_v54 = vld [vmem:[%s2041_s9 + $0x1b0] sm:$0xf]  ;;  %v1348_v57 = vor.u32 %v1676_v51, %v1347_v49  ;;  %v1658_v60 = vld [vmem:[%s2041_s9 + $0x24] sm:$0xf0] }
  0x33   : > { %920 = vmatpush.bf16.msra.mxu3 %v1492_v38  ;;  %v1708_v55 = vld [vmem:[%s2041_s9 + $0x1b4] sm:$0xf0]  ;;  %v1412_v58 = vor.u32 %v1692_v53, %v1411_v52  ;;  %v1339_v61 = vld [vmem:[%s2041_s9 + $0xa0] sm:$0xf]  ;;  %v1674_v63 = vld [vmem:[%s2041_s9 + $0xa4] sm:$0xf0]  ;;  %v1276_v4 = vor.u32 %v1658_v60, %v1275_v59 }
  0x34   : > { %879 = vmatpush.bf16.msra.mxu0 %v1292_v44  ;;  %v1476_v62 = vor.u32 %v1708_v55, %v1475_v54  ;;  %v1403_v0 = vld [vmem:[%s2041_s9 + $0x120] sm:$0xf]  ;;  %v1690_v1 = vld [vmem:[%s2041_s9 + $0x124] sm:$0xf0]  ;;  %v1340_v5 = vor.u32 %v1674_v63, %v1339_v61  ;;  %v1267_v7 = vld [vmem:[%s2041_s9 + $0x10] sm:$0xf] }
  0x35   : > { %893 = vmatpush.bf16.msra.mxu1 %v1356_v45  ;;  %v1467_v2 = vld [vmem:[%s2041_s9 + $0x1a0] sm:$0xf]  ;;  %v1706_v3 = vld [vmem:[%s2041_s9 + $0x1a4] sm:$0xf0]  ;;  %v1404_v6 = vor.u32 %v1690_v1, %v1403_v0  ;;  %v1656_v8 = vld [vmem:[%s2041_s9 + $0x14] sm:$0xf0] }
  0x36   : > { %907 = vmatpush.bf16.msra.mxu2 %v1420_v46  ;;  %v1331_v9 = vld [vmem:[%s2041_s9 + $0x90] sm:$0xf]  ;;  %v1468_v10 = vor.u32 %v1706_v3, %v1467_v2  ;;  %v1672_v11 = vld [vmem:[%s2041_s9 + $0x94] sm:$0xf0]  ;;  %v1268_v16 = vor.u32 %v1656_v8, %v1267_v7  ;;  %v1259_v17 = vld [vmem:[%s2041_s9] sm:$0xf] }
  0x37   : > { %921 = vmatpush.bf16.msra.mxu3 %v1484_v50  ;;  %v1395_v12 = vld [vmem:[%s2041_s9 + $0x110] sm:$0xf]  ;;  %v1688_v13 = vld [vmem:[%s2041_s9 + $0x114] sm:$0xf0]  ;;  %v1654_v18 = vld [vmem:[%s2041_s9 + $0x4] sm:$0xf0]  ;;  %v1332_v19 = vor.u32 %v1672_v11, %v1331_v9 }
  0x38   : > { %880 = vmatpush.bf16.msra.mxu0 %v1284_v56  ;;  %v1459_v14 = vld [vmem:[%s2041_s9 + $0x190] sm:$0xf]  ;;  %v1704_v15 = vld [vmem:[%s2041_s9 + $0x194] sm:$0xf0]  ;;  %v1396_v20 = vor.u32 %v1688_v13, %v1395_v12  ;;  %v1323_v21 = vld [vmem:[%s2041_s9 + $0x80] sm:$0xf]  ;;  %v1260_v31 = vor.u32 %v1654_v18, %v1259_v17 }
  0x39   : > { %894 = vmatpush.bf16.msra.mxu1 %v1348_v57  ;;  %v1670_v22 = vld [vmem:[%s2041_s9 + $0x84] sm:$0xf0]  ;;  %v1387_v23 = vld [vmem:[%s2041_s9 + $0x100] sm:$0xf]  ;;  %v1460_v24 = vor.u32 %v1704_v15, %v1459_v14  ;;  %v1571_v28 = vld [vmem:[%s2041_s9 + $0x270] sm:$0xf] }
  0x3a   : > { %908 = vmatpush.bf16.msra.mxu2 %v1412_v58  ;;  %v1686_v25 = vld [vmem:[%s2041_s9 + $0x104] sm:$0xf0]  ;;  %v1451_v26 = vld [vmem:[%s2041_s9 + $0x180] sm:$0xf]  ;;  %v1732_v29 = vld [vmem:[%s2041_s9 + $0x274] sm:$0xf0]  ;;  %v1324_v35 = vor.u32 %v1670_v22, %v1323_v21 }
  0x3b   : > { %922 = vmatpush.bf16.msra.mxu3 %v1476_v62  ;;  %v1702_v27 = vld [vmem:[%s2041_s9 + $0x184] sm:$0xf0]  ;;  %v1635_v30 = vld [vmem:[%s2041_s9 + $0x2f0] sm:$0xf]  ;;  %v1748_v32 = vld [vmem:[%s2041_s9 + $0x2f4] sm:$0xf0]  ;;  %v1388_v36 = vor.u32 %v1686_v25, %v1387_v23  ;;  %v1572_v40 = vor.u32 %v1732_v29, %v1571_v28 }
  0x3c   : > { %881 = vmatpush.bf16.msra.mxu0 %v1276_v4  ;;  %v1667_v33 = vld [vmem:[%s2041_s9 + $0x74] sm:$0xf]  ;;  %v1317_v34 = vld [vmem:[%s2041_s9 + $0x78] sm:$0xf0]  ;;  %v1452_v39 = vor.u32 %v1702_v27, %v1451_v26  ;;  %v1563_v41 = vld [vmem:[%s2041_s9 + $0x260] sm:$0xf]  ;;  %v1636_v43 = vor.u32 %v1748_v32, %v1635_v30 }
  0x3d   : > { %895 = vmatpush.bf16.msra.mxu1 %v1340_v5  ;;  %v1683_v37 = vld [vmem:[%s2041_s9 + $0xf4] sm:$0xf]  ;;  %v1381_v38 = vld [vmem:[%s2041_s9 + $0xf8] sm:$0xf0]  ;;  %v1730_v42 = vld [vmem:[%s2041_s9 + $0x264] sm:$0xf0]  ;;  %v1320_v44 = vor.u32 %v1667_v33, %v1317_v34 }
  0x3e   : > { %909 = vmatpush.bf16.msra.mxu2 %v1404_v6  ;;  %v1627_v45 = vld [vmem:[%s2041_s9 + $0x2e0] sm:$0xf]  ;;  %v1746_v46 = vld [vmem:[%s2041_s9 + $0x2e4] sm:$0xf0]  ;;  %v1665_v47 = vld [vmem:[%s2041_s9 + $0x64] sm:$0xf]  ;;  %v1384_v48 = vor.u32 %v1683_v37, %v1381_v38  ;;  %v1564_v55 = vor.u32 %v1730_v42, %v1563_v41 }
  0x3f   : > { %923 = vmatpush.bf16.msra.mxu3 %v1468_v10  ;;  %v1309_v49 = vld [vmem:[%s2041_s9 + $0x68] sm:$0xf0]  ;;  %v1681_v50 = vld [vmem:[%s2041_s9 + $0xe4] sm:$0xf]  ;;  %v1555_v52 = vld [vmem:[%s2041_s9 + $0x250] sm:$0xf]  ;;  %v1628_v60 = vor.u32 %v1746_v46, %v1627_v45 }
  0x40   : > { %882 = vmatpush.bf16.msra.mxu0 %v1268_v16  ;;  %v1373_v51 = vld [vmem:[%s2041_s9 + $0xe8] sm:$0xf0]  ;;  %v1235_v53 = vld [vmem:[%s2333_s0] sm:$0xf]  ;;  %v1650_v54 = vld [vmem:[%s2333_s0 + $0x14] sm:$0xf0]  ;;  %v1312_v61 = vor.u32 %v1665_v47, %v1309_v49 }
  0x41   : > { %896 = vmatpush.bf16.msra.mxu1 %v1332_v19  ;;  %v1728_v56 = vld [vmem:[%s2041_s9 + $0x254] sm:$0xf0]  ;;  %v1619_v57 = vld [vmem:[%s2041_s9 + $0x2d0] sm:$0xf]  ;;  %v2145_v59 = vor.u32 %v1650_v54, %v1235_v53  ;;  %v1663_v62 = vld [vmem:[%s2041_s9 + $0x54] sm:$0xf]  ;;  %v1376_v1 = vor.u32 %v1681_v50, %v1373_v51 }
  0x42   : > { %910 = vmatpush.bf16.msra.mxu2 %v1396_v20  ;;  %v1744_v58 = vld [vmem:[%s2041_s9 + $0x2d4] sm:$0xf0]  ;;  %v1301_v63 = vld [vmem:[%s2041_s9 + $0x58] sm:$0xf0]  ;;  %v1679_v0 = vld [vmem:[%s2041_s9 + $0xd4] sm:$0xf]  ;;  %v1556_v9 = vor.u32 %v1728_v56, %v1555_v52 }
  0x43   : > { %924 = vmatpush.bf16.msra.mxu3 %v1460_v24  ;;  %v1365_v2 = vld [vmem:[%s2041_s9 + $0xd8] sm:$0xf0]  ;;  %v1647_v3 = vld [vmem:[%s2333_s0 + $0x4] sm:$0xf]  ;;  %v1243_v6 = vld [vmem:[%s2333_s0 + $0x8] sm:$0xf]  ;;  %v1620_v12 = vor.u32 %v1744_v58, %v1619_v57  ;;  %v1304_v13 = vor.u32 %v1663_v62, %v1301_v63 }
  0x44   : > { %883 = vmatpush.bf16.msra.mxu0 %v1260_v31  ;;  %v1237_v4 = vld [vmem:[%s2333_s0 + $0x18] sm:$0xf0]  ;;  %v1651_v7 = vld [vmem:[%s2333_s0 + $0x1c] sm:$0xf0]  ;;  %v1648_v8 = vld [vmem:[%s2333_s0 + $0xc] sm:$0xf]  ;;  %v1368_v18 = vor.u32 %v1679_v0, %v1365_v2 }
  0x45   : > { %897 = vmatpush.bf16.msra.mxu1 %v1324_v35  ;;  %v2158_v5 = vor.u32 %v1647_v3, %v1237_v4  ;;  %v2169_v10 = vor.u32 %v1651_v7, %v1243_v6  ;;  %v1245_v11 = vld [vmem:[%s2333_s0 + $0x20] sm:$0xf0]  ;;  %v1547_v14 = vld [vmem:[%s2041_s9 + $0x240] sm:$0xf]  ;;  %v1726_v15 = vld [vmem:[%s2041_s9 + $0x244] sm:$0xf0] }
  0x46   : > { %911 = vmatpush.bf16.msra.mxu2 %v1388_v36  ;;  %v1611_v16 = vld [vmem:[%s2041_s9 + $0x2c0] sm:$0xf]  ;;  %v2177_v17 = vor.u32 %v1648_v8, %v1245_v11  ;;  %v1742_v19 = vld [vmem:[%s2041_s9 + $0x2c4] sm:$0xf0]  ;;  %v1661_v20 = vld [vmem:[%s2041_s9 + $0x44] sm:$0xf]  ;;  %v1548_v24 = vor.u32 %v1726_v15, %v1547_v14 }
  0x47   : > { %925 = vmatpush.bf16.msra.mxu3 %v1452_v39  ;;  %884 = vmatmul.bf16.vlgmr.msra.gmra.mxu0 %v2145_v59  ;;  %v1293_v21 = vld [vmem:[%s2041_s9 + $0x48] sm:$0xf0]  ;;  %v1677_v22 = vld [vmem:[%s2041_s9 + $0xc4] sm:$0xf]  ;;  %v1612_v25 = vor.u32 %v1742_v19, %v1611_v16  ;;  %v1539_v27 = vld [vmem:[%s2041_s9 + $0x230] sm:$0xf] }
  0x48   : > { %932 = vmatpush.bf16.msrb.mxu0 %v1572_v40  ;;  %898 = vmatmul.bf16.vlgmr.msra.gmra.mxu1 %v2158_v5  ;;  %v1357_v23 = vld [vmem:[%s2041_s9 + $0xc8] sm:$0xf0]  ;;  %v1296_v26 = vor.u32 %v1661_v20, %v1293_v21  ;;  %v1724_v28 = vld [vmem:[%s2041_s9 + $0x234] sm:$0xf0]  ;;  %v1603_v29 = vld [vmem:[%s2041_s9 + $0x2b0] sm:$0xf] }
  0x49   : > { %946 = vmatpush.bf16.msrb.mxu1 %v1636_v43  ;;  %912 = vmatmul.bf16.vlgmr.msra.gmra.mxu2 %v2169_v10  ;;  %v1360_v30 = vor.u32 %v1677_v22, %v1357_v23  ;;  %v1740_v31 = vld [vmem:[%s2041_s9 + $0x2b4] sm:$0xf0]  ;;  %v1659_v32 = vld [vmem:[%s2041_s9 + $0x34] sm:$0xf]  ;;  %v1285_v33 = vld [vmem:[%s2041_s9 + $0x38] sm:$0xf0]  ;;  %v1540_v36 = vor.u32 %v1724_v28, %v1539_v27 }
  0x4a   : > { %960 = vmatpush.bf16.msrb.mxu2 %v1320_v44  ;;  %926 = vmatmul.bf16.vlgmr.msra.gmra.mxu3 %v2177_v17  ;;  %v1675_v34 = vld [vmem:[%s2041_s9 + $0xb4] sm:$0xf]  ;;  %v1349_v35 = vld [vmem:[%s2041_s9 + $0xb8] sm:$0xf0]  ;;  %v1604_v37 = vor.u32 %v1740_v31, %v1603_v29  ;;  %v1288_v38 = vor.u32 %v1659_v32, %v1285_v33  ;;  %v1531_v39 = vld [vmem:[%s2041_s9 + $0x220] sm:$0xf] }
  0x4b   : > { %974 = vmatpush.bf16.msrb.mxu3 %v1384_v48  ;;  %v1722_v40 = vld [vmem:[%s2041_s9 + $0x224] sm:$0xf0]  ;;  %v1595_v41 = vld [vmem:[%s2041_s9 + $0x2a0] sm:$0xf]  ;;  %v1352_v42 = vor.u32 %v1675_v34, %v1349_v35  ;;  %v1657_v44 = vld [vmem:[%s2041_s9 + $0x24] sm:$0xf] }
  0x4c   : > { %933 = vmatpush.bf16.msrb.mxu0 %v1564_v55  ;;  %v1738_v43 = vld [vmem:[%s2041_s9 + $0x2a4] sm:$0xf0]  ;;  %v1277_v45 = vld [vmem:[%s2041_s9 + $0x28] sm:$0xf0]  ;;  %v1673_v46 = vld [vmem:[%s2041_s9 + $0xa4] sm:$0xf]  ;;  %v1532_v48 = vor.u32 %v1722_v40, %v1531_v39 }
  0x4d   : > { %947 = vmatpush.bf16.msrb.mxu1 %v1628_v60  ;;  %v1341_v47 = vld [vmem:[%s2041_s9 + $0xa8] sm:$0xf0]  ;;  %v1596_v49 = vor.u32 %v1738_v43, %v1595_v41  ;;  %v1280_v50 = vor.u32 %v1657_v44, %v1277_v45  ;;  %v1523_v51 = vld [vmem:[%s2041_s9 + $0x210] sm:$0xf]  ;;  %v1720_v52 = vld [vmem:[%s2041_s9 + $0x214] sm:$0xf0] }
  0x4e   : > { %961 = vmatpush.bf16.msrb.mxu2 %v1312_v61  ;;  %v1587_v53 = vld [vmem:[%s2041_s9 + $0x290] sm:$0xf]  ;;  %v1344_v54 = vor.u32 %v1673_v46, %v1341_v47  ;;  %v1736_v55 = vld [vmem:[%s2041_s9 + $0x294] sm:$0xf0]  ;;  %v1655_v56 = vld [vmem:[%s2041_s9 + $0x14] sm:$0xf]  ;;  %v1524_v61 = vor.u32 %v1720_v52, %v1523_v51 }
  0x4f   : > { %975 = vmatpush.bf16.msrb.mxu3 %v1376_v1  ;;  %v1269_v57 = vld [vmem:[%s2041_s9 + $0x18] sm:$0xf0]  ;;  %v1671_v58 = vld [vmem:[%s2041_s9 + $0x94] sm:$0xf]  ;;  %v1515_v62 = vld [vmem:[%s2041_s9 + $0x200] sm:$0xf]  ;;  %v1588_v1 = vor.u32 %v1736_v55, %v1587_v53 }
  0x50   : > { %934 = vmatpush.bf16.msrb.mxu0 %v1556_v9  ;;  %v1333_v60 = vld [vmem:[%s2041_s9 + $0x98] sm:$0xf0]  ;;  %v1718_v63 = vld [vmem:[%s2041_s9 + $0x204] sm:$0xf0]  ;;  %v1579_v0 = vld [vmem:[%s2041_s9 + $0x280] sm:$0xf]  ;;  %v1272_v2 = vor.u32 %v1655_v56, %v1269_v57 }
  0x51   : > { %948 = vmatpush.bf16.msrb.mxu1 %v1620_v12  ;;  %v1734_v3 = vld [vmem:[%s2041_s9 + $0x284] sm:$0xf0]  ;;  %v1653_v4 = vld [vmem:[%s2041_s9 + $0x4] sm:$0xf]  ;;  %v1261_v6 = vld [vmem:[%s2041_s9 + $0x8] sm:$0xf0]  ;;  %v1336_v7 = vor.u32 %v1671_v58, %v1333_v60  ;;  %v1516_v15 = vor.u32 %v1718_v63, %v1515_v62 }
  0x52   : > { %962 = vmatpush.bf16.msrb.mxu2 %v1304_v13  ;;  %v1669_v8 = vld [vmem:[%s2041_s9 + $0x84] sm:$0xf]  ;;  %v1325_v9 = vld [vmem:[%s2041_s9 + $0x88] sm:$0xf0]  ;;  %v1699_v11 = vld [vmem:[%s2041_s9 + $0x174] sm:$0xf]  ;;  %v1580_v20 = vor.u32 %v1734_v3, %v1579_v0  ;;  %v1264_v21 = vor.u32 %v1653_v4, %v1261_v6 }
  0x53   : > { %976 = vmatpush.bf16.msrb.mxu3 %v1368_v18  ;;  %v1445_v12 = vld [vmem:[%s2041_s9 + $0x178] sm:$0xf0]  ;;  %v1715_v13 = vld [vmem:[%s2041_s9 + $0x1f4] sm:$0xf]  ;;  %v1251_v23 = vld [vmem:[%s2333_s0 + $0x10] sm:$0xf] }
  0x54   : > { %935 = vmatpush.bf16.msrb.mxu0 %v1548_v24  ;;  %v1509_v14 = vld [vmem:[%s2041_s9 + $0x1f8] sm:$0xf0]  ;;  %v1731_v16 = vld [vmem:[%s2041_s9 + $0x274] sm:$0xf]  ;;  %v1652_v24 = vld [vmem:[%s2333_s0 + $0x24] sm:$0xf0] }
  0x55   : > { %949 = vmatpush.bf16.msrb.mxu1 %v1612_v25  ;;  %v1573_v18 = vld [vmem:[%s2041_s9 + $0x278] sm:$0xf0]  ;;  %v1747_v19 = vld [vmem:[%s2041_s9 + $0x2f4] sm:$0xf]  ;;  %v1328_v25 = vor.u32 %v1669_v8, %v1325_v9  ;;  %v1253_v28 = vld [vmem:[%s2333_s0 + $0x28] sm:$0xf0]  ;;  %v1512_v29 = vor.u32 %v1715_v13, %v1509_v14  ;;  %v2242_v35 = vor.u32 %v1652_v24, %v1251_v23 }
  0x56   : > { %963 = vmatpush.bf16.msrb.mxu2 %v1296_v26  ;;  %v1637_v22 = vld [vmem:[%s2041_s9 + $0x2f8] sm:$0xf0]  ;;  %v1448_v26 = vor.u32 %v1699_v11, %v1445_v12  ;;  %v1649_v27 = vld [vmem:[%s2333_s0 + $0x14] sm:$0xf]  ;;  %v1697_v31 = vld [vmem:[%s2041_s9 + $0x164] sm:$0xf] }
  0x57   : > { %977 = vmatpush.bf16.msrb.mxu3 %v1360_v30  ;;  %v1576_v30 = vor.u32 %v1731_v16, %v1573_v18  ;;  %v1437_v32 = vld [vmem:[%s2041_s9 + $0x168] sm:$0xf0]  ;;  %v1713_v33 = vld [vmem:[%s2041_s9 + $0x1e4] sm:$0xf]  ;;  %v1640_v34 = vor.u32 %v1747_v19, %v1637_v22  ;;  %v2247_v39 = vor.u32 %v1649_v27, %v1253_v28  ;;  %v1695_v45 = vld [vmem:[%s2041_s9 + $0x154] sm:$0xf] }
  0x58   : > { %936 = vmatpush.bf16.msrb.mxu0 %v1540_v36  ;;  %v1501_v36 = vld [vmem:[%s2041_s9 + $0x1e8] sm:$0xf0]  ;;  %v1745_v40 = vld [vmem:[%s2041_s9 + $0x2e4] sm:$0xf]  ;;  %v1429_v46 = vld [vmem:[%s2041_s9 + $0x158] sm:$0xf0] }
  0x59   : > { %950 = vmatpush.bf16.msrb.mxu1 %v1604_v37  ;;  %v1729_v37 = vld [vmem:[%s2041_s9 + $0x264] sm:$0xf]  ;;  %v1629_v41 = vld [vmem:[%s2041_s9 + $0x2e8] sm:$0xf0]  ;;  %v1504_v43 = vor.u32 %v1713_v33, %v1501_v36  ;;  %v1711_v47 = vld [vmem:[%s2041_s9 + $0x1d4] sm:$0xf] }
  0x5a   : > { %964 = vmatpush.bf16.msrb.mxu2 %v1288_v38  ;;  %v1565_v38 = vld [vmem:[%s2041_s9 + $0x268] sm:$0xf0]  ;;  %v1557_v51 = vld [vmem:[%s2041_s9 + $0x258] sm:$0xf0]  ;;  %v1743_v52 = vld [vmem:[%s2041_s9 + $0x2d4] sm:$0xf] }
  0x5b   : > { %978 = vmatpush.bf16.msrb.mxu3 %v1352_v42  ;;  %v1440_v42 = vor.u32 %v1697_v31, %v1437_v32  ;;  %v1568_v44 = vor.u32 %v1729_v37, %v1565_v38  ;;  %v1621_v53 = vld [vmem:[%s2041_s9 + $0x2d8] sm:$0xf0]  ;;  %v1693_v57 = vld [vmem:[%s2041_s9 + $0x144] sm:$0xf]  ;;  %v1421_v58 = vld [vmem:[%s2041_s9 + $0x148] sm:$0xf0] }
  0x5c   : > { %937 = vmatpush.bf16.msrb.mxu0 %v1532_v48  ;;  %v1632_v48 = vor.u32 %v1745_v40, %v1629_v41  ;;  %v1709_v60 = vld [vmem:[%s2041_s9 + $0x1c4] sm:$0xf]  ;;  %v1549_v63 = vld [vmem:[%s2041_s9 + $0x248] sm:$0xf0]  ;;  %v1691_v4 = vld [vmem:[%s2041_s9 + $0x134] sm:$0xf] }
  0x5d   : > { %951 = vmatpush.bf16.msrb.mxu1 %v1596_v49  ;;  %v1493_v49 = vld [vmem:[%s2041_s9 + $0x1d8] sm:$0xf0]  ;;  %v1725_v62 = vld [vmem:[%s2041_s9 + $0x244] sm:$0xf]  ;;  %v1613_v0 = vld [vmem:[%s2041_s9 + $0x2c8] sm:$0xf0] }
  0x5e   : > { %965 = vmatpush.bf16.msrb.mxu2 %v1280_v50  ;;  %v1727_v50 = vld [vmem:[%s2041_s9 + $0x254] sm:$0xf]  ;;  %v1496_v55 = vor.u32 %v1711_v47, %v1493_v49  ;;  %v1552_v3 = vor.u32 %v1725_v62, %v1549_v63  ;;  %v1413_v6 = vld [vmem:[%s2041_s9 + $0x138] sm:$0xf0]  ;;  %v1689_v19 = vld [vmem:[%s2041_s9 + $0x124] sm:$0xf] }
  0x5f   : > { %979 = vmatpush.bf16.msrb.mxu3 %v1344_v54  ;;  %v1432_v54 = vor.u32 %v1695_v45, %v1429_v46  ;;  %v1560_v56 = vor.u32 %v1727_v50, %v1557_v51  ;;  %v1477_v9 = vld [vmem:[%s2041_s9 + $0x1b8] sm:$0xf0]  ;;  %v1723_v11 = vld [vmem:[%s2041_s9 + $0x234] sm:$0xf]  ;;  %v1469_v23 = vld [vmem:[%s2041_s9 + $0x1a8] sm:$0xf0] }
  0x60   : > { %938 = vmatpush.bf16.msrb.mxu0 %v1524_v61  ;;  %v1485_v61 = vld [vmem:[%s2041_s9 + $0x1c8] sm:$0xf0]  ;;  %v1541_v12 = vld [vmem:[%s2041_s9 + $0x238] sm:$0xf0]  ;;  %v1739_v13 = vld [vmem:[%s2041_s9 + $0x2b4] sm:$0xf] }
  0x61   : > { %952 = vmatpush.bf16.msrb.mxu1 %v1588_v1  ;;  %v1424_v1 = vor.u32 %v1693_v57, %v1421_v58  ;;  %v1605_v14 = vld [vmem:[%s2041_s9 + $0x2b8] sm:$0xf0]  ;;  %v1544_v18 = vor.u32 %v1723_v11, %v1541_v12  ;;  %v1721_v24 = vld [vmem:[%s2041_s9 + $0x224] sm:$0xf]  ;;  %v1597_v27 = vld [vmem:[%s2041_s9 + $0x2a8] sm:$0xf0] }
  0x62   : > { %966 = vmatpush.bf16.msrb.mxu2 %v1272_v2  ;;  %v1488_v2 = vor.u32 %v1709_v60, %v1485_v61  ;;  %v1608_v22 = vor.u32 %v1739_v13, %v1605_v14  ;;  %v1687_v31 = vld [vmem:[%s2041_s9 + $0x114] sm:$0xf]  ;;  %v1397_v32 = vld [vmem:[%s2041_s9 + $0x118] sm:$0xf0]  ;;  %v1685_v45 = vld [vmem:[%s2041_s9 + $0x104] sm:$0xf] }
  0x63   : > { %980 = vmatpush.bf16.msrb.mxu3 %v1336_v7  ;;  %v1707_v7 = vld [vmem:[%s2041_s9 + $0x1b4] sm:$0xf]  ;;  %v1461_v36 = vld [vmem:[%s2041_s9 + $0x198] sm:$0xf0]  ;;  %v1389_v46 = vld [vmem:[%s2041_s9 + $0x108] sm:$0xf0] }
  0x64   : > { %939 = vmatpush.bf16.msrb.mxu0 %v1516_v15  ;;  %v1416_v15 = vor.u32 %v1691_v4, %v1413_v6  ;;  %v1480_v16 = vor.u32 %v1707_v7, %v1477_v9  ;;  %v1703_v33 = vld [vmem:[%s2041_s9 + $0x194] sm:$0xf]  ;;  %v1525_v38 = vld [vmem:[%s2041_s9 + $0x218] sm:$0xf0]  ;;  %v1701_v47 = vld [vmem:[%s2041_s9 + $0x184] sm:$0xf] }
  0x65   : > { %953 = vmatpush.bf16.msrb.mxu1 %v1580_v20  ;;  %v1405_v20 = vld [vmem:[%s2041_s9 + $0x128] sm:$0xf0]  ;;  %v1719_v37 = vld [vmem:[%s2041_s9 + $0x214] sm:$0xf]  ;;  %v1589_v41 = vld [vmem:[%s2041_s9 + $0x298] sm:$0xf0] }
  0x66   : > { %967 = vmatpush.bf16.msrb.mxu2 %v1264_v21  ;;  %v1705_v21 = vld [vmem:[%s2041_s9 + $0x1a4] sm:$0xf]  ;;  %v1408_v28 = vor.u32 %v1689_v19, %v1405_v20  ;;  %v1735_v40 = vld [vmem:[%s2041_s9 + $0x294] sm:$0xf]  ;;  %v1453_v49 = vld [vmem:[%s2041_s9 + $0x188] sm:$0xf0] }
  0x67   : > { %981 = vmatpush.bf16.msrb.mxu3 %v1328_v25  ;;  %940 = vmatmul.bf16.vlgmr.msrb.gmra.mxu0 %v2242_v35  ;;  %v1533_v25 = vld [vmem:[%s2041_s9 + $0x228] sm:$0xf0]  ;;  %v1717_v50 = vld [vmem:[%s2041_s9 + $0x204] sm:$0xf] }
  0x68   : > { %988 = vmatpush.bf16.msra.mxu0 %v1448_v26  ;;  %954 = vmatmul.bf16.vlgmr.msrb.gmra.mxu1 %v2247_v39  ;;  %v1737_v26 = vld [vmem:[%s2041_s9 + $0x2a4] sm:$0xf]  ;;  %v1517_v51 = vld [vmem:[%s2041_s9 + $0x208] sm:$0xf0] }
  0x69   : > { %1002 = vmatpush.bf16.msra.mxu1 %v1512_v29  ;;  %968 = vmatmul.bf16.vlgmr.msrb.gmra.mxu2 %v2145_v59  ;;  %v1624_v59 = vor.u32 %v1743_v52, %v1621_v53  ;;  %v1472_v29 = vor.u32 %v1705_v21, %v1469_v23  ;;  %v1733_v52 = vld [vmem:[%s2041_s9 + $0x284] sm:$0xf]  ;;  %v1581_v53 = vld [vmem:[%s2041_s9 + $0x288] sm:$0xf0] }
  0x6a   : > { %1016 = vmatpush.bf16.msra.mxu2 %v1576_v30  ;;  %982 = vmatmul.bf16.vlgmr.msrb.gmra.mxu3 %v2158_v5  ;;  %v1741_v5 = vld [vmem:[%s2041_s9 + $0x2c4] sm:$0xf]  ;;  %v1536_v30 = vor.u32 %v1721_v24, %v1533_v25  ;;  %v1584_v57 = vor.u32 %v1733_v52, %v1581_v53  ;;  %s1232_s9 = sshll.u32 %s2037_s6, 4  ;;  %s1749_s6 = sshll.u32 (%p2004_p9), %s1921_s15, 3 }
  0x6b   : > { %1030 = vmatpush.bf16.msra.mxu3 %v1640_v34  ;;  %v1616_v8 = vor.u32 %v1741_v5, %v1613_v0  ;;  %v1600_v34 = vor.u32 %v1737_v26, %v1597_v27  ;;  %s1086_s30 = scalar_lea.vmem (%p2004_p9), %s2336_s3, %s1749_s6 }
  0x6c   : > { %989 = vmatpush.bf16.msra.mxu0 %v1440_v42  ;;  %v1400_v42 = vor.u32 %v1687_v31, %v1397_v32 }
  0x6d   : > { %1003 = vmatpush.bf16.msra.mxu1 %v1504_v43  ;;  %v1464_v43 = vor.u32 %v1703_v33, %v1461_v36 }
  0x6e   : > { %1017 = vmatpush.bf16.msra.mxu2 %v1568_v44  ;;  %v1528_v44 = vor.u32 %v1719_v37, %v1525_v38 }
  0x6f   : > { %1031 = vmatpush.bf16.msra.mxu3 %v1632_v48  ;;  %v1592_v48 = vor.u32 %v1735_v40, %v1589_v41 }
  0x70   : > { %990 = vmatpush.bf16.msra.mxu0 %v1432_v54  ;;  %v1392_v54 = vor.u32 %v1685_v45, %v1389_v46 }
  0x71   : > { %1004 = vmatpush.bf16.msra.mxu1 %v1496_v55  ;;  %v1456_v55 = vor.u32 %v1701_v47, %v1453_v49 }
  0x72   : > { %1018 = vmatpush.bf16.msra.mxu2 %v1560_v56  ;;  %v1520_v56 = vor.u32 %v1717_v50, %v1517_v51 }
  0x73   : > { %1032 = vmatpush.bf16.msra.mxu3 %v1624_v59 }
  0x74   : > { %991 = vmatpush.bf16.msra.mxu0 %v1424_v1 }
  0x75   : > { %1005 = vmatpush.bf16.msra.mxu1 %v1488_v2 }
  0x76   : > { %1019 = vmatpush.bf16.msra.mxu2 %v1552_v3 }
  0x77   : > { %1033 = vmatpush.bf16.msra.mxu3 %v1616_v8 }
  0x78   : > { %992 = vmatpush.bf16.msra.mxu0 %v1416_v15  ;;  %v1059_v15 = vld [vmem:[%s2049_s10] sm:$0x3]  ;;  %s242_s10 = scalar_lea.vmem [#allocation7], %s1232_s9 }
  0x79   : > { %1006 = vmatpush.bf16.msra.mxu1 %v1480_v16  ;;  %v1061_v20 = vperm.slane %v1059_v15, 0  ;;  %v1062_v27 = vperm.slane %v1059_v15, 1 }
  0x7a   : > { %1020 = vmatpush.bf16.msra.mxu2 %v1544_v18 }
  0x7b   : > { %1034 = vmatpush.bf16.msra.mxu3 %v1608_v22 }
  0x7c   : > { %993 = vmatpush.bf16.msra.mxu0 %v1408_v28 }
  0x7d   : > { %1007 = vmatpush.bf16.msra.mxu1 %v1472_v29 }
  0x7e   : > { %1021 = vmatpush.bf16.msra.mxu2 %v1536_v30 }
  0x7f   : > { %1035 = vmatpush.bf16.msra.mxu3 %v1600_v34 }
  0x80   : > { %994 = vmatpush.bf16.msra.mxu0 %v1400_v42 }
  0x81   : > { %1008 = vmatpush.bf16.msra.mxu1 %v1464_v43 }
  0x82   : > { %1022 = vmatpush.bf16.msra.mxu2 %v1528_v44 }
  0x83   : > { %1036 = vmatpush.bf16.msra.mxu3 %v1592_v48 }
  0x84   : > { %995 = vmatpush.bf16.msra.mxu0 %v1392_v54 }
  0x85   : > { %1009 = vmatpush.bf16.msra.mxu1 %v1456_v55 }
  0x86   : > { %1023 = vmatpush.bf16.msra.mxu2 %v1520_v56 }
  0x87   : > { %1037 = vmatpush.bf16.msra.mxu3 %v1584_v57  ;;  %996 = vmatmul.bf16.vlgmr.msra.gmra.mxu0 %v2169_v10 }
  0x88   : > { %1010 = vmatmul.bf16.vlgmr.msra.gmra.mxu1 %v2177_v17 }
  0x89   : > { %1024 = vmatmul.bf16.vlgmr.msra.gmra.mxu2 %v2242_v35 }
  0x8a   : > { %1038 = vmatmul.bf16.vlgmr.msra.gmra.mxu3 %v2247_v39 }
  0xc4   : > { %v885_v58 = vpop.f32.mrf.mxu0 }
  0xc5   : > { %v899_v60 = vpop.f32.mrf.mxu1 }
  0xc6   : > { %v900_v4 = vadd.f32 %v899_v60, %v885_v58 }
  0xcc   : > { %v913_v61 = vpop.f32.mrf.mxu2  ;;  %v887_v62 = vpop.f32.mrf.mxu0 }
  0xcd   : > { %v927_v59 = vpop.f32.mrf.mxu3  ;;  %v901_v63 = vpop.f32.mrf.mxu1  ;;  %v914_v17 = vadd.f32 %v913_v61, %v900_v4 }
  0xce   : > { %v902_v39 = vadd.f32 %v901_v63, %v887_v62 }
  0xcf   : > { %v928_v35 = vadd.f32 %v927_v59, %v914_v17 }
  0xd4   : > { %v915_v0 = vpop.f32.mrf.mxu2 }
  0xd5   : > { %v929_v5 = vpop.f32.mrf.mxu3  ;;  %v916_v18 = vadd.f32 %v915_v0, %v902_v39 }
  0xd7   : > { %v930_v23 = vadd.f32 %v929_v5, %v916_v18 }
  0xe4   : > { %v941_v1 = vpop.f32.mrf.mxu0 }
  0xe5   : > { %v955_v2 = vpop.f32.mrf.mxu1  ;;  %v942_v13 = vadd.f32 %v941_v1, %v928_v35 }
  0xe7   : > { %v956_v19 = vadd.f32 %v955_v2, %v942_v13 }
  0xe9   : > { %v1065_v29 = vadd.f32 %v1061_v20, %v956_v19 }
  0xeb   : > { %v1069_v36 = vmax.f32 %v1065_v29, 0.0 }
  0xec   : > { %v969_v3 = vpop.f32.mrf.mxu2  ;;  %v943_v6 = vpop.f32.mrf.mxu0 }
  0xed   : > { %v983_v10 = vpop.f32.mrf.mxu3  ;;  %v957_v7 = vpop.f32.mrf.mxu1  ;;  %v944_v30 = vadd.f32 %v943_v6, %v930_v23 }
  0xee   : > { %v984_v9 = vadd.f32 %v983_v10, %v969_v3 }
  0xef   : > { %v958_v37 = vadd.f32 %v957_v7, %v944_v30 }
  0xf1   : > { %v1067_v45 = vadd.f32 %v1061_v20, %v958_v37 }
  0xf3   : > { %v1071_v48 = vmax.f32 %v1067_v45, 0.0 }
  0xf4   : > { %v971_v8 = vpop.f32.mrf.mxu2 }
  0xf5   : > { %v985_v11 = vpop.f32.mrf.mxu3 }
  0xf6   : > { %v986_v24 = vadd.f32 %v985_v11, %v971_v8 }
 0x104   : > { %v997_v12 = vpop.f32.mrf.mxu0 }
 0x105   : > { %v998_v14 = vadd.f32 %v997_v12, %v984_v9  ;;  %v1011_v16 = vpop.f32.mrf.mxu1 }
 0x107   : > { %v1012_v21 = vadd.f32 %v1011_v16, %v998_v14 }
 0x10c   : > { %v1025_v22 = vpop.f32.mrf.mxu2  ;;  %v999_v28 = vpop.f32.mrf.mxu0 }
 0x10d   : > { %v1026_v25 = vadd.f32 %v1025_v22, %v1012_v21  ;;  %v1039_v26 = vpop.f32.mrf.mxu3  ;;  %v1000_v32 = vadd.f32 %v999_v28, %v986_v24  ;;  %v1013_v34 = vpop.f32.mrf.mxu1 }
 0x10f   : > { %v1040_v31 = vadd.f32 %v1039_v26, %v1026_v25  ;;  %v1014_v40 = vadd.f32 %v1013_v34, %v1000_v32 }
 0x111   : > { %v1066_v33 = vadd.f32 %v1062_v27, %v1040_v31 }
 0x113   : > { %v1070_v38 = vmax.f32 %v1066_v33, 0.0 }
 0x114   : > { %v1027_v41 = vpop.f32.mrf.mxu2 }
 0x115   : > { %v1073_v42 = vpack.c.bf16 %v1070_v38, %v1069_v36  ;;  %v1028_v43 = vadd.f32 %v1027_v41, %v1014_v40  ;;  %v1041_v44 = vpop.f32.mrf.mxu3 }
 0x117   : > { %1075 = vst [vmem:[%s242_s10] sm:$0xff] %v1073_v42  ;;  %v1042_v46 = vadd.f32 %v1041_v44, %v1028_v43 }
 0x119   : > { %v1068_v47 = vadd.f32 %v1062_v27, %v1042_v46 }
 0x11b   : > { %v1072_v49 = vmax.f32 %v1068_v47, 0.0  ;;  %1083 = sbr.rel (!%p2004_p9) target bundleno = 296 (0x128), region = 52 }
 0x11d   : > { %v1074_v50 = vpack.c.bf16 %v1072_v49, %v1071_v48 }
 0x11e   : > { %v1117_v51 = vld [vmem:[%s242_s10] sm:$0xff] (%p2004_p9) }
 0x11f   : > { %1076 = vst [vmem:[%s242_s10 + $0x8] sm:$0xff] %v1074_v50 }
 0x120   : > { %1118 = vst [vmem:[%s1086_s30] sm:$0xff] %v1117_v51 }
 0x126   : > { %v1119_v52 = vld [vmem:[%s242_s10 + $0x8] sm:$0xff] }
 0x127   : > { %1120 = vst [vmem:[%s1086_s30 + $0x10] sm:$0xff] %v1119_v52 }
 0x128 PF: > { %s19_s17 = sadd.s32 1, %s1929_s17   ;;  %s2341_s12 = smov %s1913_s13 }
 0x129   : > { %p16_p1 = scmp.ge.s32.totalorder %s19_s17, 4   ;;  %s2342_s13 = smov %s1917_s14 }
 0x12a   : > { %s2343_s14 = smov %s2002_s24  ;;  %s2344_s15 = smov %s1925_s16 }
 0x12b   : > { %s2345_s16 = smov %s2347_s19  ;;  %18 = sbr.rel (!%p16_p1) target bundleno = 6 (0x6), region = 132 }
 0x130   :  { %1136 = vsyncpa [#allocation4], 1 }
 0x131   :  { %1138 = vsyncpa [#allocation4 + $0x1], 1 }
 0x132   :  { %1139 = vsyncpa [#allocation6], 1 }
 0x133   :  { %1141 = vsyncpa [#allocation6 + $0x1], 1 }

// kernel: neural_network_forward.3
= control target key start
LH: loop header
LB: loop body
LE: loop exit
PB: predicated region body
PF: predicated region fallthrough
CT: control target
= control target key end

     0   :  { %s3161_s1 = inlined_call_operand.vmem [shape: bf16[512,512], index: 1, kind: input, shape index: {}]   ;;  %s3162_s0 = inlined_call_operand.vmem [shape: bf16[16,512], index: 0, kind: input, shape index: {}]   ;;  %s3163_s3 = inlined_call_operand.vmem [shape: bf16[512,128], index: 3, kind: input, shape index: {}]   ;;  %s3164_s4 = inlined_call_operand.vmem [shape: f32[1,128], index: 4, kind: input, shape index: {}]   ;;  %s3165_s2 = inlined_call_operand.vmem [shape: f32[1,512], index: 2, kind: input, shape index: {}]   ;;  %s3166_s5 = inlined_call_operand.vmem [shape: f32[16,128], index: 5, kind: output, shape index: {}]  }
   0x1   :  { %v1510_v0 = vld [vmem:[%s3161_s1 + $0xe0] sm:$0xf]  ;;  %v2070_v1 = vld [vmem:[%s3161_s1 + $0xec] sm:$0xf0] }
   0x2   :  { %v1638_v2 = vld [vmem:[%s3161_s1 + $0x1e0] sm:$0xf]  ;;  %v1511_v3 = vor.u32 %v2070_v1, %v1510_v0  ;;  %v2102_v4 = vld [vmem:[%s3161_s1 + $0x1ec] sm:$0xf0] }
   0x3   :  { %v1766_v5 = vld [vmem:[%s3161_s1 + $0x2e0] sm:$0xf]  ;;  %v2134_v6 = vld [vmem:[%s3161_s1 + $0x2ec] sm:$0xf0]  ;;  %v1639_v7 = vor.u32 %v2102_v4, %v1638_v2 }
   0x4   :  { %v1767_v8 = vor.u32 %v2134_v6, %v1766_v5  ;;  %v1894_v9 = vld [vmem:[%s3161_s1 + $0x3e0] sm:$0xf]  ;;  %v2166_v10 = vld [vmem:[%s3161_s1 + $0x3ec] sm:$0xf0]  ;;  %822 = vmatpush.bf16.msra.mxu0 %v1511_v3 }
   0x5   :  { %v1494_v11 = vld [vmem:[%s3161_s1 + $0xc0] sm:$0xf]  ;;  %v1895_v12 = vor.u32 %v2166_v10, %v1894_v9  ;;  %v2066_v13 = vld [vmem:[%s3161_s1 + $0xcc] sm:$0xf0]  ;;  %836 = vmatpush.bf16.msra.mxu1 %v1639_v7 }
   0x6   :  { %v1622_v14 = vld [vmem:[%s3161_s1 + $0x1c0] sm:$0xf]  ;;  %v2098_v15 = vld [vmem:[%s3161_s1 + $0x1cc] sm:$0xf0]  ;;  %850 = vmatpush.bf16.msra.mxu2 %v1767_v8  ;;  %v1495_v16 = vor.u32 %v2066_v13, %v1494_v11 }
   0x7   :  { %v1623_v17 = vor.u32 %v2098_v15, %v1622_v14  ;;  %v1750_v18 = vld [vmem:[%s3161_s1 + $0x2c0] sm:$0xf]  ;;  %v2130_v19 = vld [vmem:[%s3161_s1 + $0x2cc] sm:$0xf0]  ;;  %864 = vmatpush.bf16.msra.mxu3 %v1895_v12 }
   0x8   :  { %v1878_v20 = vld [vmem:[%s3161_s1 + $0x3c0] sm:$0xf]  ;;  %v1751_v21 = vor.u32 %v2130_v19, %v1750_v18  ;;  %v2162_v22 = vld [vmem:[%s3161_s1 + $0x3cc] sm:$0xf0]  ;;  %823 = vmatpush.bf16.msra.mxu0 %v1495_v16 }
   0x9   :  { %v1478_v23 = vld [vmem:[%s3161_s1 + $0xa0] sm:$0xf]  ;;  %v2062_v24 = vld [vmem:[%s3161_s1 + $0xac] sm:$0xf0]  ;;  %v1879_v25 = vor.u32 %v2162_v22, %v1878_v20  ;;  %837 = vmatpush.bf16.msra.mxu1 %v1623_v17 }
   0xa   :  { %v1606_v26 = vld [vmem:[%s3161_s1 + $0x1a0] sm:$0xf]  ;;  %v2094_v27 = vld [vmem:[%s3161_s1 + $0x1ac] sm:$0xf0]  ;;  %v1479_v29 = vor.u32 %v2062_v24, %v1478_v23  ;;  %851 = vmatpush.bf16.msra.mxu2 %v1751_v21 }
   0xb   :  { %v1734_v28 = vld [vmem:[%s3161_s1 + $0x2a0] sm:$0xf]  ;;  %v2126_v30 = vld [vmem:[%s3161_s1 + $0x2ac] sm:$0xf0]  ;;  %v1607_v33 = vor.u32 %v2094_v27, %v1606_v26  ;;  %865 = vmatpush.bf16.msra.mxu3 %v1879_v25 }
   0xc   :  { %v1862_v31 = vld [vmem:[%s3161_s1 + $0x3a0] sm:$0xf]  ;;  %v2158_v32 = vld [vmem:[%s3161_s1 + $0x3ac] sm:$0xf0]  ;;  %v1735_v34 = vor.u32 %v2126_v30, %v1734_v28  ;;  %824 = vmatpush.bf16.msra.mxu0 %v1479_v29  ;;  %v2068_v28 = vld [vmem:[%s3161_s1 + $0xe4] sm:$0xf] }
   0xd   :  { %v1462_v35 = vld [vmem:[%s3161_s1 + $0x80] sm:$0xf]  ;;  %v2058_v36 = vld [vmem:[%s3161_s1 + $0x8c] sm:$0xf0]  ;;  %v1863_v38 = vor.u32 %v2158_v32, %v1862_v31  ;;  %838 = vmatpush.bf16.msra.mxu1 %v1607_v33  ;;  %v1512_v29 = vld [vmem:[%s3161_s1 + $0xf0] sm:$0xf0] }
   0xe   :  { %v1590_v37 = vld [vmem:[%s3161_s1 + $0x180] sm:$0xf]  ;;  %v2090_v39 = vld [vmem:[%s3161_s1 + $0x18c] sm:$0xf0]  ;;  %v1463_v44 = vor.u32 %v2058_v36, %v1462_v35  ;;  %852 = vmatpush.bf16.msra.mxu2 %v1735_v34  ;;  %v2100_v30 = vld [vmem:[%s3161_s1 + $0x1e4] sm:$0xf] }
   0xf   :  { %v1718_v40 = vld [vmem:[%s3161_s1 + $0x280] sm:$0xf]  ;;  %v2122_v41 = vld [vmem:[%s3161_s1 + $0x28c] sm:$0xf0]  ;;  %v1591_v45 = vor.u32 %v2090_v39, %v1590_v37  ;;  %866 = vmatpush.bf16.msra.mxu3 %v1863_v38  ;;  %v1640_v32 = vld [vmem:[%s3161_s1 + $0x1f0] sm:$0xf0] }
  0x10   :  { %v1846_v42 = vld [vmem:[%s3161_s1 + $0x380] sm:$0xf]  ;;  %v2154_v43 = vld [vmem:[%s3161_s1 + $0x38c] sm:$0xf0]  ;;  %v1719_v46 = vor.u32 %v2122_v41, %v1718_v40  ;;  %825 = vmatpush.bf16.msra.mxu0 %v1463_v44  ;;  %v2132_v33 = vld [vmem:[%s3161_s1 + $0x2e4] sm:$0xf]  ;;  %v1515_v40 = vor.u32 %v2068_v28, %v1512_v29 }
  0x11   :  { %v1446_v47 = vld [vmem:[%s3161_s1 + $0x60] sm:$0xf]  ;;  %v2054_v48 = vld [vmem:[%s3161_s1 + $0x6c] sm:$0xf0]  ;;  %v1847_v50 = vor.u32 %v2154_v43, %v1846_v42  ;;  %839 = vmatpush.bf16.msra.mxu1 %v1591_v45  ;;  %v1768_v34 = vld [vmem:[%s3161_s1 + $0x2f0] sm:$0xf0]  ;;  %v1643_v43 = vor.u32 %v2100_v30, %v1640_v32 }
  0x12   :  { %v1574_v49 = vld [vmem:[%s3161_s1 + $0x160] sm:$0xf]  ;;  %v2086_v51 = vld [vmem:[%s3161_s1 + $0x16c] sm:$0xf0]  ;;  %v1447_v56 = vor.u32 %v2054_v48, %v1446_v47  ;;  %853 = vmatpush.bf16.msra.mxu2 %v1719_v46  ;;  %v2164_v37 = vld [vmem:[%s3161_s1 + $0x3e4] sm:$0xf]  ;;  %v1771_v44 = vor.u32 %v2132_v33, %v1768_v34 }
  0x13   :  { %v1702_v52 = vld [vmem:[%s3161_s1 + $0x260] sm:$0xf]  ;;  %v2118_v53 = vld [vmem:[%s3161_s1 + $0x26c] sm:$0xf0]  ;;  %v1575_v57 = vor.u32 %v2086_v51, %v1574_v49  ;;  %867 = vmatpush.bf16.msra.mxu3 %v1847_v50  ;;  %v1896_v38 = vld [vmem:[%s3161_s1 + $0x3f0] sm:$0xf0] }
  0x14   :  { %v1830_v54 = vld [vmem:[%s3161_s1 + $0x360] sm:$0xf]  ;;  %v2150_v55 = vld [vmem:[%s3161_s1 + $0x36c] sm:$0xf0]  ;;  %v1703_v58 = vor.u32 %v2118_v53, %v1702_v52  ;;  %826 = vmatpush.bf16.msra.mxu0 %v1447_v56  ;;  %v2064_v41 = vld [vmem:[%s3161_s1 + $0xc4] sm:$0xf]  ;;  %v1899_v48 = vor.u32 %v2164_v37, %v1896_v38 }
  0x15   :  { %v1430_v59 = vld [vmem:[%s3161_s1 + $0x40] sm:$0xf]  ;;  %v2050_v60 = vld [vmem:[%s3161_s1 + $0x4c] sm:$0xf0]  ;;  %v1831_v62 = vor.u32 %v2150_v55, %v1830_v54  ;;  %840 = vmatpush.bf16.msra.mxu1 %v1575_v57  ;;  %v1496_v42 = vld [vmem:[%s3161_s1 + $0xd0] sm:$0xf0] }
  0x16   :  { %v1558_v61 = vld [vmem:[%s3161_s1 + $0x140] sm:$0xf]  ;;  %v2082_v63 = vld [vmem:[%s3161_s1 + $0x14c] sm:$0xf0]  ;;  %v1431_v4 = vor.u32 %v2050_v60, %v1430_v59  ;;  %854 = vmatpush.bf16.msra.mxu2 %v1703_v58  ;;  %v2096_v45 = vld [vmem:[%s3161_s1 + $0x1c4] sm:$0xf]  ;;  %v1499_v55 = vor.u32 %v2064_v41, %v1496_v42 }
  0x17   :  { %v1686_v0 = vld [vmem:[%s3161_s1 + $0x240] sm:$0xf]  ;;  %v2114_v1 = vld [vmem:[%s3161_s1 + $0x24c] sm:$0xf0]  ;;  %v1559_v5 = vor.u32 %v2082_v63, %v1558_v61  ;;  %868 = vmatpush.bf16.msra.mxu3 %v1831_v62  ;;  %v1624_v46 = vld [vmem:[%s3161_s1 + $0x1d0] sm:$0xf0] }
  0x18   :  { %v1814_v2 = vld [vmem:[%s3161_s1 + $0x340] sm:$0xf]  ;;  %v2146_v3 = vld [vmem:[%s3161_s1 + $0x34c] sm:$0xf0]  ;;  %v1687_v6 = vor.u32 %v2114_v1, %v1686_v0  ;;  %827 = vmatpush.bf16.msra.mxu0 %v1431_v4  ;;  %v2128_v47 = vld [vmem:[%s3161_s1 + $0x2c4] sm:$0xf]  ;;  %v1627_v56 = vor.u32 %v2096_v45, %v1624_v46 }
  0x19   :  { %v1414_v7 = vld [vmem:[%s3161_s1 + $0x20] sm:$0xf]  ;;  %v2046_v8 = vld [vmem:[%s3161_s1 + $0x2c] sm:$0xf0]  ;;  %v1815_v10 = vor.u32 %v2146_v3, %v1814_v2  ;;  %841 = vmatpush.bf16.msra.mxu1 %v1559_v5  ;;  %v1752_v49 = vld [vmem:[%s3161_s1 + $0x2d0] sm:$0xf0] }
  0x1a   :  { %v1542_v9 = vld [vmem:[%s3161_s1 + $0x120] sm:$0xf]  ;;  %v2078_v11 = vld [vmem:[%s3161_s1 + $0x12c] sm:$0xf0]  ;;  %v1415_v16 = vor.u32 %v2046_v8, %v1414_v7  ;;  %855 = vmatpush.bf16.msra.mxu2 %v1687_v6  ;;  %v2160_v50 = vld [vmem:[%s3161_s1 + $0x3c4] sm:$0xf]  ;;  %v1755_v61 = vor.u32 %v2128_v47, %v1752_v49 }
  0x1b   :  { %v1670_v12 = vld [vmem:[%s3161_s1 + $0x220] sm:$0xf]  ;;  %v2110_v13 = vld [vmem:[%s3161_s1 + $0x22c] sm:$0xf0]  ;;  %v1543_v19 = vor.u32 %v2078_v11, %v1542_v9  ;;  %869 = vmatpush.bf16.msra.mxu3 %v1815_v10  ;;  %v1880_v51 = vld [vmem:[%s3161_s1 + $0x3d0] sm:$0xf0] }
  0x1c   :  { %v1798_v14 = vld [vmem:[%s3161_s1 + $0x320] sm:$0xf]  ;;  %v2142_v15 = vld [vmem:[%s3161_s1 + $0x32c] sm:$0xf0]  ;;  %v1671_v20 = vor.u32 %v2110_v13, %v1670_v12  ;;  %828 = vmatpush.bf16.msra.mxu0 %v1415_v16  ;;  %v1390_v52 = vld [vmem:[%s3162_s0 + $0x8] sm:$0xf]  ;;  %v1883_v3 = vor.u32 %v2160_v50, %v1880_v51 }
  0x1d   :  { %v1398_v17 = vld [vmem:[%s3161_s1] sm:$0xf]  ;;  %v2042_v18 = vld [vmem:[%s3161_s1 + $0xc] sm:$0xf0]  ;;  %v1799_v24 = vor.u32 %v2142_v15, %v1798_v14  ;;  %842 = vmatpush.bf16.msra.mxu1 %v1543_v19  ;;  %v2039_v53 = vld [vmem:[%s3162_s0 + $0x14] sm:$0xf0] }
  0x1e   :  { %v1526_v21 = vld [vmem:[%s3161_s1 + $0x100] sm:$0xf]  ;;  %v2074_v22 = vld [vmem:[%s3161_s1 + $0x10c] sm:$0xf0]  ;;  %v1399_v31 = vor.u32 %v2042_v18, %v1398_v17  ;;  %856 = vmatpush.bf16.msra.mxu2 %v1671_v20  ;;  %v2480_v57 = vor.u32 %v2039_v53, %v1390_v52  ;;  %v2037_v59 = vld [vmem:[%s3162_s0 + $0xc] sm:$0xf] }
  0x1f   :  { %v1654_v23 = vld [vmem:[%s3161_s1 + $0x200] sm:$0xf]  ;;  %v2106_v25 = vld [vmem:[%s3161_s1 + $0x20c] sm:$0xf0]  ;;  %v1527_v35 = vor.u32 %v2074_v22, %v1526_v21  ;;  %870 = vmatpush.bf16.msra.mxu3 %v1799_v24  ;;  %v1392_v60 = vld [vmem:[%s3162_s0 + $0x18] sm:$0xf0] }
  0x20   :  { %v1782_v26 = vld [vmem:[%s3161_s1 + $0x300] sm:$0xf]  ;;  %v2138_v27 = vld [vmem:[%s3161_s1 + $0x30c] sm:$0xf0]  ;;  %v1655_v36 = vor.u32 %v2106_v25, %v1654_v23  ;;  %829 = vmatpush.bf16.msra.mxu0 %v1399_v31  ;;  %v2060_v62 = vld [vmem:[%s3161_s1 + $0xa4] sm:$0xf]  ;;  %v2502_v2 = vor.u32 %v2037_v59, %v1392_v60 }
  0x21   :  { %v1783_v39 = vor.u32 %v2138_v27, %v1782_v26  ;;  %843 = vmatpush.bf16.msra.mxu1 %v1527_v35  ;;  %v1382_v54 = vld [vmem:[%s3162_s0] sm:$0xf]  ;;  %v2038_v58 = vld [vmem:[%s3162_s0 + $0xc] sm:$0xf0]  ;;  %v1480_v63 = vld [vmem:[%s3161_s1 + $0xb0] sm:$0xf0] }
  0x22   :  { %857 = vmatpush.bf16.msra.mxu2 %v1655_v36  ;;  %v2092_v0 = vld [vmem:[%s3161_s1 + $0x1a4] sm:$0xf]  ;;  %v2500_v1 = vor.u32 %v2038_v58, %v1382_v54  ;;  %v1608_v4 = vld [vmem:[%s3161_s1 + $0x1b0] sm:$0xf0]  ;;  %v1483_v10 = vor.u32 %v2060_v62, %v1480_v63 }
  0x23   :  { %871 = vmatpush.bf16.msra.mxu3 %v1783_v39  ;;  %v2124_v5 = vld [vmem:[%s3161_s1 + $0x2a4] sm:$0xf]  ;;  %v1736_v6 = vld [vmem:[%s3161_s1 + $0x2b0] sm:$0xf0]  ;;  %v1611_v12 = vor.u32 %v2092_v0, %v1608_v4 }
  0x24   :  { %878 = vmatpush.bf16.msrb.mxu0 %v1515_v40  ;;  %v2156_v7 = vld [vmem:[%s3161_s1 + $0x3a4] sm:$0xf]  ;;  %v1864_v8 = vld [vmem:[%s3161_s1 + $0x3b0] sm:$0xf0]  ;;  %v1739_v13 = vor.u32 %v2124_v5, %v1736_v6 }
  0x25   :  { %892 = vmatpush.bf16.msrb.mxu1 %v1643_v43  ;;  %858 = vmatmul.bf16.vlgmr.msra.gmra.mxu2 %v2480_v57  ;;  %v2036_v9 = vld [vmem:[%s3162_s0 + $0x4] sm:$0xf]  ;;  %v1384_v11 = vld [vmem:[%s3162_s0 + $0x10] sm:$0xf0]  ;;  %v1867_v18 = vor.u32 %v2156_v7, %v1864_v8 }
  0x26   :  { %906 = vmatpush.bf16.msrb.mxu2 %v1771_v44  ;;  %830 = vmatmul.bf16.vlgmr.msra.gmra.mxu0 %v2500_v1  ;;  %v2056_v14 = vld [vmem:[%s3161_s1 + $0x84] sm:$0xf]  ;;  %v1464_v15 = vld [vmem:[%s3161_s1 + $0x90] sm:$0xf0]  ;;  %v2537_v17 = vor.u32 %v2036_v9, %v1384_v11  ;;  %v1518_v11 = vld [vmem:[%s3161_s1 + $0xe8] sm:$0xf] }
  0x27   :  { %920 = vmatpush.bf16.msrb.mxu3 %v1899_v48  ;;  %v2088_v16 = vld [vmem:[%s3161_s1 + $0x184] sm:$0xf]  ;;  %v1592_v19 = vld [vmem:[%s3161_s1 + $0x190] sm:$0xf0]  ;;  %v1467_v24 = vor.u32 %v2056_v14, %v1464_v15  ;;  %v2103_v15 = vld [vmem:[%s3161_s1 + $0x1f4] sm:$0xf0] }
  0x28   :  { %872 = vmatmul.bf16.vlgmr.msra.gmra.mxu3 %v2502_v2  ;;  %879 = vmatpush.bf16.msrb.mxu0 %v1499_v55  ;;  %v2120_v20 = vld [vmem:[%s3161_s1 + $0x284] sm:$0xf]  ;;  %v1720_v21 = vld [vmem:[%s3161_s1 + $0x290] sm:$0xf0]  ;;  %v1595_v25 = vor.u32 %v2088_v16, %v1592_v19  ;;  %v1774_v16 = vld [vmem:[%s3161_s1 + $0x2e8] sm:$0xf] }
  0x29   :  { %893 = vmatpush.bf16.msrb.mxu1 %v1627_v56  ;;  %v2152_v22 = vld [vmem:[%s3161_s1 + $0x384] sm:$0xf]  ;;  %v1848_v23 = vld [vmem:[%s3161_s1 + $0x390] sm:$0xf0]  ;;  %v1723_v26 = vor.u32 %v2120_v20, %v1720_v21  ;;  %v1902_v21 = vld [vmem:[%s3161_s1 + $0x3e8] sm:$0xf] }
  0x2a   :  { %907 = vmatpush.bf16.msrb.mxu2 %v1755_v61  ;;  %844 = vmatmul.bf16.vlgmr.msra.gmra.mxu1 %v2537_v17  ;;  %v2052_v27 = vld [vmem:[%s3161_s1 + $0x64] sm:$0xf]  ;;  %v1448_v28 = vld [vmem:[%s3161_s1 + $0x70] sm:$0xf0]  ;;  %v1851_v30 = vor.u32 %v2152_v22, %v1848_v23  ;;  %v2167_v22 = vld [vmem:[%s3161_s1 + $0x3f4] sm:$0xf0] }
  0x2b   :  { %921 = vmatpush.bf16.msrb.mxu3 %v1883_v3  ;;  %v2084_v29 = vld [vmem:[%s3161_s1 + $0x164] sm:$0xf]  ;;  %v1576_v31 = vld [vmem:[%s3161_s1 + $0x170] sm:$0xf0]  ;;  %v1451_v36 = vor.u32 %v2052_v27, %v1448_v28  ;;  %v1502_v27 = vld [vmem:[%s3161_s1 + $0xc8] sm:$0xf] }
  0x2c   :  { %880 = vmatpush.bf16.msrb.mxu0 %v1483_v10  ;;  %v2116_v32 = vld [vmem:[%s3161_s1 + $0x264] sm:$0xf]  ;;  %v1704_v33 = vld [vmem:[%s3161_s1 + $0x270] sm:$0xf0]  ;;  %v1579_v37 = vor.u32 %v2084_v29, %v1576_v31  ;;  %v2067_v28 = vld [vmem:[%s3161_s1 + $0xd4] sm:$0xf0] }
  0x2d   :  { %894 = vmatpush.bf16.msrb.mxu1 %v1611_v12  ;;  %v2148_v34 = vld [vmem:[%s3161_s1 + $0x364] sm:$0xf]  ;;  %v1832_v35 = vld [vmem:[%s3161_s1 + $0x370] sm:$0xf0]  ;;  %v1707_v38 = vor.u32 %v2116_v32, %v1704_v33  ;;  %v2071_v12 = vld [vmem:[%s3161_s1 + $0xf4] sm:$0xf0] }
  0x2e   :  { %908 = vmatpush.bf16.msrb.mxu2 %v1739_v13  ;;  %v2048_v39 = vld [vmem:[%s3161_s1 + $0x44] sm:$0xf]  ;;  %v1432_v40 = vld [vmem:[%s3161_s1 + $0x50] sm:$0xf0]  ;;  %v1835_v42 = vor.u32 %v2148_v34, %v1832_v35  ;;  %v1646_v13 = vld [vmem:[%s3161_s1 + $0x1e8] sm:$0xf] }
  0x2f   :  { %922 = vmatpush.bf16.msrb.mxu3 %v1867_v18  ;;  %v2080_v41 = vld [vmem:[%s3161_s1 + $0x144] sm:$0xf]  ;;  %v1560_v43 = vld [vmem:[%s3161_s1 + $0x150] sm:$0xf0]  ;;  %v1435_v48 = vor.u32 %v2048_v39, %v1432_v40  ;;  %v2135_v18 = vld [vmem:[%s3161_s1 + $0x2f4] sm:$0xf0] }
  0x30   :  { %881 = vmatpush.bf16.msrb.mxu0 %v1467_v24  ;;  %v2112_v44 = vld [vmem:[%s3161_s1 + $0x244] sm:$0xf]  ;;  %v1688_v45 = vld [vmem:[%s3161_s1 + $0x250] sm:$0xf0]  ;;  %v1563_v49 = vor.u32 %v2080_v41, %v1560_v43  ;;  %v1519_v24 = vor.u32 %v2071_v12, %v1518_v11  ;;  %v1630_v29 = vld [vmem:[%s3161_s1 + $0x1c8] sm:$0xf] }
  0x31   :  { %895 = vmatpush.bf16.msrb.mxu1 %v1595_v25  ;;  %v2144_v46 = vld [vmem:[%s3161_s1 + $0x344] sm:$0xf]  ;;  %v1816_v47 = vld [vmem:[%s3161_s1 + $0x350] sm:$0xf0]  ;;  %v1691_v50 = vor.u32 %v2112_v44, %v1688_v45  ;;  %v1647_v25 = vor.u32 %v2103_v15, %v1646_v13  ;;  %v2099_v31 = vld [vmem:[%s3161_s1 + $0x1d4] sm:$0xf0] }
  0x32   :  { %909 = vmatpush.bf16.msrb.mxu2 %v1723_v26  ;;  %v2044_v51 = vld [vmem:[%s3161_s1 + $0x24] sm:$0xf]  ;;  %v1416_v52 = vld [vmem:[%s3161_s1 + $0x30] sm:$0xf0]  ;;  %v1819_v54 = vor.u32 %v2144_v46, %v1816_v47  ;;  %v1775_v26 = vor.u32 %v2135_v18, %v1774_v16  ;;  %v1758_v32 = vld [vmem:[%s3161_s1 + $0x2c8] sm:$0xf] }
  0x33   :  { %923 = vmatpush.bf16.msrb.mxu3 %v1851_v30  ;;  %v2076_v53 = vld [vmem:[%s3161_s1 + $0x124] sm:$0xf]  ;;  %v1544_v55 = vld [vmem:[%s3161_s1 + $0x130] sm:$0xf0]  ;;  %v1419_v61 = vor.u32 %v2044_v51, %v1416_v52  ;;  %v1903_v30 = vor.u32 %v2167_v22, %v1902_v21  ;;  %v2131_v33 = vld [vmem:[%s3161_s1 + $0x2d4] sm:$0xf0] }
  0x34   :  { %882 = vmatpush.bf16.msrb.mxu0 %v1451_v36  ;;  %v2108_v56 = vld [vmem:[%s3161_s1 + $0x224] sm:$0xf]  ;;  %v1672_v58 = vld [vmem:[%s3161_s1 + $0x230] sm:$0xf0]  ;;  %v1547_v0 = vor.u32 %v2076_v53, %v1544_v55  ;;  %v1886_v34 = vld [vmem:[%s3161_s1 + $0x3c8] sm:$0xf]  ;;  %v1503_v36 = vor.u32 %v2067_v28, %v1502_v27 }
  0x35   :  { %896 = vmatpush.bf16.msrb.mxu1 %v1579_v37  ;;  %v2140_v59 = vld [vmem:[%s3161_s1 + $0x324] sm:$0xf]  ;;  %v1800_v60 = vld [vmem:[%s3161_s1 + $0x330] sm:$0xf0]  ;;  %v1675_v3 = vor.u32 %v2108_v56, %v1672_v58  ;;  %v2163_v35 = vld [vmem:[%s3161_s1 + $0x3d4] sm:$0xf0]  ;;  %v1631_v37 = vor.u32 %v2099_v31, %v1630_v29 }
  0x36   :  { %910 = vmatpush.bf16.msrb.mxu2 %v1707_v38  ;;  %v2040_v62 = vld [vmem:[%s3161_s1 + $0x4] sm:$0xf]  ;;  %v1400_v63 = vld [vmem:[%s3161_s1 + $0x10] sm:$0xf0]  ;;  %v1803_v7 = vor.u32 %v2140_v59, %v1800_v60  ;;  %v1759_v38 = vor.u32 %v2131_v33, %v1758_v32  ;;  %v1486_v39 = vld [vmem:[%s3161_s1 + $0xa8] sm:$0xf] }
  0x37   :  { %924 = vmatpush.bf16.msrb.mxu3 %v1835_v42  ;;  %v2072_v4 = vld [vmem:[%s3161_s1 + $0x104] sm:$0xf]  ;;  %v1528_v5 = vld [vmem:[%s3161_s1 + $0x110] sm:$0xf0]  ;;  %v1403_v14 = vor.u32 %v2040_v62, %v1400_v63  ;;  %v2063_v40 = vld [vmem:[%s3161_s1 + $0xb4] sm:$0xf0]  ;;  %v1887_v42 = vor.u32 %v2163_v35, %v1886_v34 }
  0x38   :  { %883 = vmatpush.bf16.msrb.mxu0 %v1435_v48  ;;  %v2104_v6 = vld [vmem:[%s3161_s1 + $0x204] sm:$0xf]  ;;  %v1656_v8 = vld [vmem:[%s3161_s1 + $0x210] sm:$0xf0]  ;;  %v1531_v19 = vor.u32 %v2072_v4, %v1528_v5  ;;  %v1614_v41 = vld [vmem:[%s3161_s1 + $0x1a8] sm:$0xf]  ;;  %v1487_v48 = vor.u32 %v2063_v40, %v1486_v39 }
  0x39   :  { %897 = vmatpush.bf16.msrb.mxu1 %v1563_v49  ;;  %v2136_v9 = vld [vmem:[%s3161_s1 + $0x304] sm:$0xf]  ;;  %v1784_v10 = vld [vmem:[%s3161_s1 + $0x310] sm:$0xf0]  ;;  %v1659_v20 = vor.u32 %v2104_v6, %v1656_v8  ;;  %v2095_v43 = vld [vmem:[%s3161_s1 + $0x1b4] sm:$0xf0] }
  0x3a   :  { %911 = vmatpush.bf16.msrb.mxu2 %v1691_v50  ;;  %v1787_v23 = vor.u32 %v2136_v9, %v1784_v10  ;;  %v1742_v44 = vld [vmem:[%s3161_s1 + $0x2a8] sm:$0xf]  ;;  %v2127_v45 = vld [vmem:[%s3161_s1 + $0x2b4] sm:$0xf0]  ;;  %v1615_v49 = vor.u32 %v2095_v43, %v1614_v41 }
  0x3b   :  { %925 = vmatpush.bf16.msrb.mxu3 %v1819_v54  ;;  %v1870_v46 = vld [vmem:[%s3161_s1 + $0x3a8] sm:$0xf]  ;;  %v2159_v47 = vld [vmem:[%s3161_s1 + $0x3b4] sm:$0xf0]  ;;  %v1743_v50 = vor.u32 %v2127_v45, %v1742_v44 }
  0x3c   :  { %884 = vmatpush.bf16.msrb.mxu0 %v1419_v61  ;;  %v1470_v51 = vld [vmem:[%s3161_s1 + $0x88] sm:$0xf]  ;;  %v2059_v52 = vld [vmem:[%s3161_s1 + $0x94] sm:$0xf0]  ;;  %v1871_v54 = vor.u32 %v2159_v47, %v1870_v46 }
  0x3d   :  { %898 = vmatpush.bf16.msrb.mxu1 %v1547_v0  ;;  %v1598_v53 = vld [vmem:[%s3161_s1 + $0x188] sm:$0xf]  ;;  %v2091_v55 = vld [vmem:[%s3161_s1 + $0x194] sm:$0xf0]  ;;  %v1471_v61 = vor.u32 %v2059_v52, %v1470_v51  ;;  %v1648_v52 = vld [vmem:[%s3161_s1 + $0x1f8] sm:$0xf0] }
  0x3e   :  { %912 = vmatpush.bf16.msrb.mxu2 %v1675_v3  ;;  %v1726_v56 = vld [vmem:[%s3161_s1 + $0x288] sm:$0xf]  ;;  %v2123_v58 = vld [vmem:[%s3161_s1 + $0x294] sm:$0xf0]  ;;  %v1599_v62 = vor.u32 %v2091_v55, %v1598_v53  ;;  %v2133_v53 = vld [vmem:[%s3161_s1 + $0x2ec] sm:$0xf] }
  0x3f   :  { %926 = vmatpush.bf16.msrb.mxu3 %v1803_v7  ;;  %v1854_v59 = vld [vmem:[%s3161_s1 + $0x388] sm:$0xf]  ;;  %v2155_v60 = vld [vmem:[%s3161_s1 + $0x394] sm:$0xf0]  ;;  %v1727_v63 = vor.u32 %v2123_v58, %v1726_v56  ;;  %v2165_v58 = vld [vmem:[%s3161_s1 + $0x3ec] sm:$0xf] }
  0x40   :  { %885 = vmatpush.bf16.msrb.mxu0 %v1403_v14  ;;  %v1454_v0 = vld [vmem:[%s3161_s1 + $0x68] sm:$0xf]  ;;  %v2055_v3 = vld [vmem:[%s3161_s1 + $0x74] sm:$0xf0]  ;;  %v1855_v5 = vor.u32 %v2155_v60, %v1854_v59  ;;  %v1904_v59 = vld [vmem:[%s3161_s1 + $0x3f8] sm:$0xf0] }
  0x41   :  { %899 = vmatpush.bf16.msrb.mxu1 %v1531_v19  ;;  %v1582_v4 = vld [vmem:[%s3161_s1 + $0x168] sm:$0xf]  ;;  %v2087_v6 = vld [vmem:[%s3161_s1 + $0x174] sm:$0xf0]  ;;  %v1455_v11 = vor.u32 %v2055_v3, %v1454_v0  ;;  %v2065_v0 = vld [vmem:[%s3161_s1 + $0xcc] sm:$0xf] }
  0x42   :  { %913 = vmatpush.bf16.msrb.mxu2 %v1659_v20  ;;  %v1710_v7 = vld [vmem:[%s3161_s1 + $0x268] sm:$0xf]  ;;  %v2119_v8 = vld [vmem:[%s3161_s1 + $0x274] sm:$0xf0]  ;;  %v1583_v12 = vor.u32 %v2087_v6, %v1582_v4  ;;  %v1504_v3 = vld [vmem:[%s3161_s1 + $0xd8] sm:$0xf0] }
  0x43   :  { %927 = vmatpush.bf16.msrb.mxu3 %v1787_v23  ;;  %886 = vmatmul.bf16.vlgmr.msrb.gmra.mxu0 %v2500_v1  ;;  %v1838_v9 = vld [vmem:[%s3161_s1 + $0x368] sm:$0xf]  ;;  %v2151_v10 = vld [vmem:[%s3161_s1 + $0x374] sm:$0xf0]  ;;  %v1711_v13 = vor.u32 %v2119_v8, %v1710_v7  ;;  %v2097_v4 = vld [vmem:[%s3161_s1 + $0x1cc] sm:$0xf] }
  0x44   :  { %934 = vmatpush.bf16.msra.mxu0 %v1519_v24  ;;  %900 = vmatmul.bf16.vlgmr.msrb.gmra.mxu1 %v2537_v17  ;;  %v1438_v14 = vld [vmem:[%s3161_s1 + $0x48] sm:$0xf]  ;;  %v2051_v15 = vld [vmem:[%s3161_s1 + $0x54] sm:$0xf0]  ;;  %v1839_v18 = vor.u32 %v2151_v10, %v1838_v9  ;;  %v1632_v6 = vld [vmem:[%s3161_s1 + $0x1d8] sm:$0xf0] }
  0x45   :  { %948 = vmatpush.bf16.msra.mxu1 %v1647_v25  ;;  %914 = vmatmul.bf16.vlgmr.msrb.gmra.mxu2 %v2480_v57  ;;  %v1566_v16 = vld [vmem:[%s3161_s1 + $0x148] sm:$0xf]  ;;  %v2083_v19 = vld [vmem:[%s3161_s1 + $0x154] sm:$0xf0]  ;;  %v1439_v24 = vor.u32 %v2051_v15, %v1438_v14  ;;  %v2129_v7 = vld [vmem:[%s3161_s1 + $0x2cc] sm:$0xf] }
  0x46   :  { %962 = vmatpush.bf16.msra.mxu2 %v1775_v26  ;;  %928 = vmatmul.bf16.vlgmr.msrb.gmra.mxu3 %v2502_v2  ;;  %v1694_v20 = vld [vmem:[%s3161_s1 + $0x248] sm:$0xf]  ;;  %v2115_v21 = vld [vmem:[%s3161_s1 + $0x254] sm:$0xf0]  ;;  %v1567_v25 = vor.u32 %v2083_v19, %v1566_v16  ;;  %v1760_v8 = vld [vmem:[%s3161_s1 + $0x2d8] sm:$0xf0] }
  0x47   :  { %976 = vmatpush.bf16.msra.mxu3 %v1903_v30  ;;  %v1822_v22 = vld [vmem:[%s3161_s1 + $0x348] sm:$0xf]  ;;  %v2147_v23 = vld [vmem:[%s3161_s1 + $0x354] sm:$0xf0]  ;;  %v1695_v26 = vor.u32 %v2115_v21, %v1694_v20  ;;  %v2161_v9 = vld [vmem:[%s3161_s1 + $0x3cc] sm:$0xf] }
  0x48   :  { %935 = vmatpush.bf16.msra.mxu0 %v1503_v36  ;;  %v1422_v27 = vld [vmem:[%s3161_s1 + $0x28] sm:$0xf]  ;;  %v2047_v28 = vld [vmem:[%s3161_s1 + $0x34] sm:$0xf0]  ;;  %v1823_v30 = vor.u32 %v2147_v23, %v1822_v22  ;;  %v1888_v10 = vld [vmem:[%s3161_s1 + $0x3d8] sm:$0xf0] }
  0x49   :  { %949 = vmatpush.bf16.msra.mxu1 %v1631_v37  ;;  %v1550_v29 = vld [vmem:[%s3161_s1 + $0x128] sm:$0xf]  ;;  %v2079_v31 = vld [vmem:[%s3161_s1 + $0x134] sm:$0xf0]  ;;  %v1423_v36 = vor.u32 %v2047_v28, %v1422_v27  ;;  %v2061_v14 = vld [vmem:[%s3161_s1 + $0xac] sm:$0xf] }
  0x4a   :  { %963 = vmatpush.bf16.msra.mxu2 %v1759_v38  ;;  %v1678_v32 = vld [vmem:[%s3161_s1 + $0x228] sm:$0xf]  ;;  %v2111_v33 = vld [vmem:[%s3161_s1 + $0x234] sm:$0xf0]  ;;  %v1551_v39 = vor.u32 %v2079_v31, %v1550_v29  ;;  %v1488_v15 = vld [vmem:[%s3161_s1 + $0xb8] sm:$0xf0] }
  0x4b   :  { %977 = vmatpush.bf16.msra.mxu3 %v1887_v42  ;;  %v1806_v34 = vld [vmem:[%s3161_s1 + $0x328] sm:$0xf]  ;;  %v2143_v35 = vld [vmem:[%s3161_s1 + $0x334] sm:$0xf0]  ;;  %v1679_v40 = vor.u32 %v2111_v33, %v1678_v32  ;;  %v2093_v16 = vld [vmem:[%s3161_s1 + $0x1ac] sm:$0xf] }
  0x4c   :  { %936 = vmatpush.bf16.msra.mxu0 %v1487_v48  ;;  %v1406_v37 = vld [vmem:[%s3161_s1 + $0x8] sm:$0xf]  ;;  %v2043_v38 = vld [vmem:[%s3161_s1 + $0x14] sm:$0xf0]  ;;  %v1807_v44 = vor.u32 %v2143_v35, %v1806_v34  ;;  %v2069_v48 = vld [vmem:[%s3161_s1 + $0xec] sm:$0xf] }
  0x4d   :  { %950 = vmatpush.bf16.msra.mxu1 %v1615_v49  ;;  %v1534_v41 = vld [vmem:[%s3161_s1 + $0x108] sm:$0xf]  ;;  %v2075_v42 = vld [vmem:[%s3161_s1 + $0x114] sm:$0xf0]  ;;  %v1520_v49 = vld [vmem:[%s3161_s1 + $0xf8] sm:$0xf0]  ;;  %v1407_v51 = vor.u32 %v2043_v38, %v1406_v37 }
  0x4e   :  { %964 = vmatpush.bf16.msra.mxu2 %v1743_v50  ;;  %v1662_v43 = vld [vmem:[%s3161_s1 + $0x208] sm:$0xf]  ;;  %v2107_v45 = vld [vmem:[%s3161_s1 + $0x214] sm:$0xf0]  ;;  %v2101_v50 = vld [vmem:[%s3161_s1 + $0x1ec] sm:$0xf]  ;;  %v1535_v55 = vor.u32 %v2075_v42, %v1534_v41 }
  0x4f   :  { %978 = vmatpush.bf16.msra.mxu3 %v1871_v54  ;;  %v1790_v46 = vld [vmem:[%s3161_s1 + $0x308] sm:$0xf]  ;;  %v2139_v47 = vld [vmem:[%s3161_s1 + $0x314] sm:$0xf0]  ;;  %v1776_v54 = vld [vmem:[%s3161_s1 + $0x2f8] sm:$0xf0]  ;;  %v1663_v56 = vor.u32 %v2107_v45, %v1662_v43 }
  0x50   :  { %937 = vmatpush.bf16.msra.mxu0 %v1471_v61  ;;  %v1791_v60 = vor.u32 %v2139_v47, %v1790_v46  ;;  %v1523_v61 = vor.u32 %v2069_v48, %v1520_v49  ;;  %v1616_v19 = vld [vmem:[%s3161_s1 + $0x1b8] sm:$0xf0]  ;;  %v2125_v20 = vld [vmem:[%s3161_s1 + $0x2ac] sm:$0xf] }
  0x51   :  { %951 = vmatpush.bf16.msra.mxu1 %v1599_v62  ;;  %v1651_v62 = vor.u32 %v2101_v50, %v1648_v52  ;;  %v1744_v21 = vld [vmem:[%s3161_s1 + $0x2b8] sm:$0xf0]  ;;  %v2157_v22 = vld [vmem:[%s3161_s1 + $0x3ac] sm:$0xf] }
  0x52   :  { %965 = vmatpush.bf16.msra.mxu2 %v1727_v63  ;;  %v1779_v63 = vor.u32 %v2133_v53, %v1776_v54  ;;  %v1872_v23 = vld [vmem:[%s3161_s1 + $0x3b8] sm:$0xf0]  ;;  %v2057_v27 = vld [vmem:[%s3161_s1 + $0x8c] sm:$0xf] }
  0x53   :  { %979 = vmatpush.bf16.msra.mxu3 %v1855_v5  ;;  %v1907_v5 = vor.u32 %v2165_v58, %v1904_v59  ;;  %v1472_v28 = vld [vmem:[%s3161_s1 + $0x98] sm:$0xf0]  ;;  %v2089_v29 = vld [vmem:[%s3161_s1 + $0x18c] sm:$0xf] }
  0x54   :  { %938 = vmatpush.bf16.msra.mxu0 %v1455_v11  ;;  %v1507_v11 = vor.u32 %v2065_v0, %v1504_v3  ;;  %v1600_v31 = vld [vmem:[%s3161_s1 + $0x198] sm:$0xf0]  ;;  %v2121_v32 = vld [vmem:[%s3161_s1 + $0x28c] sm:$0xf] }
  0x55   :  { %952 = vmatpush.bf16.msra.mxu1 %v1583_v12  ;;  %v1635_v12 = vor.u32 %v2097_v4, %v1632_v6  ;;  %v1728_v33 = vld [vmem:[%s3161_s1 + $0x298] sm:$0xf0]  ;;  %v2153_v34 = vld [vmem:[%s3161_s1 + $0x38c] sm:$0xf]  ;;  %v1603_v37 = vor.u32 %v2089_v29, %v1600_v31  ;;  %v2174_v29 = vld [vmem:[%s3163_s3 + $0x30] sm:$0xff] }
  0x56   :  { %966 = vmatpush.bf16.msra.mxu2 %v1711_v13  ;;  %v1763_v13 = vor.u32 %v2129_v7, %v1760_v8  ;;  %v1856_v35 = vld [vmem:[%s3161_s1 + $0x398] sm:$0xf0]  ;;  %v1731_v38 = vor.u32 %v2121_v32, %v1728_v33  ;;  %v2085_v41 = vld [vmem:[%s3161_s1 + $0x16c] sm:$0xf]  ;;  %v2172_v31 = vld [vmem:[%s3163_s3 + $0x20] sm:$0xff] }
  0x57   :  { %980 = vmatpush.bf16.msra.mxu3 %v1839_v18  ;;  %v1891_v18 = vor.u32 %v2161_v9, %v1888_v10  ;;  %v1859_v42 = vor.u32 %v2153_v34, %v1856_v35  ;;  %v1584_v43 = vld [vmem:[%s3161_s1 + $0x178] sm:$0xf0]  ;;  %v2149_v46 = vld [vmem:[%s3161_s1 + $0x36c] sm:$0xf]  ;;  %v3080_v34 = vld [vmem:[%s3165_s2] sm:$0xf] }
  0x58   :  { %939 = vmatpush.bf16.msra.mxu0 %v1439_v24  ;;  %v1491_v24 = vor.u32 %v2061_v14, %v1488_v15  ;;  %v1712_v45 = vld [vmem:[%s3161_s1 + $0x278] sm:$0xf0]  ;;  %v1587_v49 = vor.u32 %v2085_v41, %v1584_v43  ;;  %v2081_v53 = vld [vmem:[%s3161_s1 + $0x14c] sm:$0xf]  ;;  %v154_v35 = vperm.slane %v3080_v34, 0 }
  0x59   :  { %953 = vmatpush.bf16.msra.mxu1 %v1567_v25  ;;  %v1619_v25 = vor.u32 %v2093_v16, %v1616_v19  ;;  %v1840_v47 = vld [vmem:[%s3161_s1 + $0x378] sm:$0xf0]  ;;  %v2145_v59 = vld [vmem:[%s3161_s1 + $0x34c] sm:$0xf] }
  0x5a   :  { %967 = vmatpush.bf16.msra.mxu2 %v1695_v26  ;;  %v1747_v26 = vor.u32 %v2125_v20, %v1744_v21  ;;  %v1440_v52 = vld [vmem:[%s3161_s1 + $0x58] sm:$0xf0]  ;;  %v1843_v54 = vor.u32 %v2149_v46, %v1840_v47  ;;  %v2045_v0 = vld [vmem:[%s3161_s1 + $0x2c] sm:$0xf] }
  0x5b   :  { %981 = vmatpush.bf16.msra.mxu3 %v1823_v30  ;;  %v1875_v30 = vor.u32 %v2157_v22, %v1872_v23  ;;  %v1696_v58 = vld [vmem:[%s3161_s1 + $0x258] sm:$0xf0]  ;;  %v2077_v4 = vld [vmem:[%s3161_s1 + $0x12c] sm:$0xf] }
  0x5c   :  { %940 = vmatpush.bf16.msra.mxu0 %v1423_v36  ;;  %v1475_v36 = vor.u32 %v2057_v27, %v1472_v28  ;;  %v1424_v3 = vld [vmem:[%s3161_s1 + $0x38] sm:$0xf0]  ;;  %v2109_v7 = vld [vmem:[%s3161_s1 + $0x22c] sm:$0xf] }
  0x5d   :  { %954 = vmatpush.bf16.msra.mxu1 %v1551_v39  ;;  %v2053_v39 = vld [vmem:[%s3161_s1 + $0x6c] sm:$0xf]  ;;  %v1552_v6 = vld [vmem:[%s3161_s1 + $0x138] sm:$0xf0] }
  0x5e   :  { %968 = vmatpush.bf16.msra.mxu2 %v1679_v40  ;;  %v1456_v40 = vld [vmem:[%s3161_s1 + $0x78] sm:$0xf0]  ;;  %v2141_v9 = vld [vmem:[%s3161_s1 + $0x32c] sm:$0xf] }
  0x5f   :  { %982 = vmatpush.bf16.msra.mxu3 %v1807_v44  ;;  %v2117_v44 = vld [vmem:[%s3161_s1 + $0x26c] sm:$0xf]  ;;  %v1459_v48 = vor.u32 %v2053_v39, %v1456_v40  ;;  %v1680_v8 = vld [vmem:[%s3161_s1 + $0x238] sm:$0xf0]  ;;  %v2180_v39 = vld [vmem:[%s3163_s3 + $0x60] sm:$0xff] }
  0x60   :  { %941 = vmatpush.bf16.msra.mxu0 %v1407_v51  ;;  %v1715_v50 = vor.u32 %v2117_v44, %v1712_v45  ;;  %v2049_v51 = vld [vmem:[%s3161_s1 + $0x4c] sm:$0xf]  ;;  %v1808_v10 = vld [vmem:[%s3161_s1 + $0x338] sm:$0xf0] }
  0x61   :  { %955 = vmatpush.bf16.msra.mxu1 %v1535_v55  ;;  %v1568_v55 = vld [vmem:[%s3161_s1 + $0x158] sm:$0xf0]  ;;  %v2041_v14 = vld [vmem:[%s3161_s1 + $0xc] sm:$0xf] }
  0x62   :  { %969 = vmatpush.bf16.msra.mxu2 %v1663_v56  ;;  %v2113_v56 = vld [vmem:[%s3161_s1 + $0x24c] sm:$0xf]  ;;  %v1408_v15 = vld [vmem:[%s3161_s1 + $0x18] sm:$0xf0] }
  0x63   :  { %983 = vmatpush.bf16.msra.mxu3 %v1791_v60  ;;  %942 = vmatmul.bf16.vlgmr.msra.gmra.mxu0 %v2500_v1  ;;  %v1824_v60 = vld [vmem:[%s3161_s1 + $0x358] sm:$0xf0]  ;;  %v2073_v16 = vld [vmem:[%s3161_s1 + $0x10c] sm:$0xf] }
  0x64   :  { %990 = vmatpush.bf16.msrb.mxu0 %v1523_v61  ;;  %956 = vmatmul.bf16.vlgmr.msra.gmra.mxu1 %v2537_v17  ;;  %v1443_v61 = vor.u32 %v2049_v51, %v1440_v52  ;;  %v1536_v19 = vld [vmem:[%s3161_s1 + $0x118] sm:$0xf0]  ;;  %v2105_v20 = vld [vmem:[%s3161_s1 + $0x20c] sm:$0xf] }
  0x65   :  { %1004 = vmatpush.bf16.msrb.mxu1 %v1651_v62  ;;  %970 = vmatmul.bf16.vlgmr.msra.gmra.mxu2 %v2480_v57  ;;  %v1571_v62 = vor.u32 %v2081_v53, %v1568_v55  ;;  %v1664_v21 = vld [vmem:[%s3161_s1 + $0x218] sm:$0xf0]  ;;  %v2137_v22 = vld [vmem:[%s3161_s1 + $0x30c] sm:$0xf] }
  0x66   :  { %1018 = vmatpush.bf16.msrb.mxu2 %v1779_v63  ;;  %984 = vmatmul.bf16.vlgmr.msra.gmra.mxu3 %v2502_v2  ;;  %v1699_v63 = vor.u32 %v2113_v56, %v1696_v58  ;;  %v1792_v23 = vld [vmem:[%s3161_s1 + $0x318] sm:$0xf0]  ;;  %v2169_v32 = vld [vmem:[%s3163_s3 + $0x8] sm:$0xff] }
  0x67   :  { %1032 = vmatpush.bf16.msrb.mxu3 %v1907_v5  ;;  %v1827_v5 = vor.u32 %v2145_v59, %v1824_v60  ;;  %v1795_v27 = vor.u32 %v2137_v22, %v1792_v23  ;;  %v2175_v28 = vld [vmem:[%s3163_s3 + $0x38] sm:$0xff]  ;;  %v2181_v33 = vld [vmem:[%s3163_s3 + $0x68] sm:$0xff]  ;;  %v2176_v59 = vld [vmem:[%s3163_s3 + $0x40] sm:$0xff] }
  0x68   :  { %991 = vmatpush.bf16.msrb.mxu0 %v1507_v11  ;;  %v1427_v11 = vor.u32 %v2045_v0, %v1424_v3  ;;  %v2179_v44 = vld [vmem:[%s3163_s3 + $0x58] sm:$0xff]  ;;  %v2189_v0 = vld [vmem:[%s3163_s3 + $0xa8] sm:$0xff]  ;;  %v155_v3 = vperm.slane %v3080_v34, 1 }
  0x69   :  { %1005 = vmatpush.bf16.msrb.mxu1 %v1635_v12  ;;  %v1555_v12 = vor.u32 %v2077_v4, %v1552_v6  ;;  %v2191_v60 = vld [vmem:[%s3163_s3 + $0xb8] sm:$0xff] }
  0x6a   :  { %1019 = vmatpush.bf16.msrb.mxu2 %v1763_v13  ;;  %v1683_v13 = vor.u32 %v2109_v7, %v1680_v8  ;;  %v2188_v7 = vld [vmem:[%s3163_s3 + $0xa0] sm:$0xff] }
  0x6b   :  { %1033 = vmatpush.bf16.msrb.mxu3 %v1891_v18  ;;  %v1811_v18 = vor.u32 %v2141_v9, %v1808_v10  ;;  %v2187_v10 = vld [vmem:[%s3163_s3 + $0x98] sm:$0xff] }
  0x6c   :  { %992 = vmatpush.bf16.msrb.mxu0 %v1491_v24  ;;  %v1411_v24 = vor.u32 %v2041_v14, %v1408_v15 }
  0x6d   :  { %1006 = vmatpush.bf16.msrb.mxu1 %v1619_v25  ;;  %v1539_v25 = vor.u32 %v2073_v16, %v1536_v19  ;;  %v2186_v16 = vld [vmem:[%s3163_s3 + $0x90] sm:$0xff] }
  0x6e   :  { %1020 = vmatpush.bf16.msrb.mxu2 %v1747_v26  ;;  %v1667_v26 = vor.u32 %v2105_v20, %v1664_v21  ;;  %v2185_v21 = vld [vmem:[%s3163_s3 + $0x88] sm:$0xff] }
  0x6f   :  { %1034 = vmatpush.bf16.msrb.mxu3 %v1875_v30  ;;  %v2173_v30 = vld [vmem:[%s3163_s3 + $0x28] sm:$0xff] }
  0x70   :  { %993 = vmatpush.bf16.msrb.mxu0 %v1475_v36  ;;  %v2168_v36 = vld [vmem:[%s3163_s3] sm:$0xff] }
  0x71   :  { %1007 = vmatpush.bf16.msrb.mxu1 %v1603_v37 }
  0x72   :  { %1021 = vmatpush.bf16.msrb.mxu2 %v1731_v38 }
  0x73   :  { %1035 = vmatpush.bf16.msrb.mxu3 %v1859_v42 }
  0x74   :  { %994 = vmatpush.bf16.msrb.mxu0 %v1459_v48  ;;  %v2178_v48 = vld [vmem:[%s3163_s3 + $0x50] sm:$0xff] }
  0x75   :  { %1008 = vmatpush.bf16.msrb.mxu1 %v1587_v49 }
  0x76   :  { %1022 = vmatpush.bf16.msrb.mxu2 %v1715_v50 }
  0x77   :  { %1036 = vmatpush.bf16.msrb.mxu3 %v1843_v54  ;;  %v2177_v54 = vld [vmem:[%s3163_s3 + $0x48] sm:$0xff] }
  0x78   :  { %995 = vmatpush.bf16.msrb.mxu0 %v1443_v61 }
  0x79   :  { %1009 = vmatpush.bf16.msrb.mxu1 %v1571_v62  ;;  %v2190_v62 = vld [vmem:[%s3163_s3 + $0xb0] sm:$0xff] }
  0x7a   :  { %1023 = vmatpush.bf16.msrb.mxu2 %v1699_v63 }
  0x7b   :  { %1037 = vmatpush.bf16.msrb.mxu3 %v1827_v5 }
  0x7c   :  { %996 = vmatpush.bf16.msrb.mxu0 %v1427_v11 }
  0x7d   :  { %1010 = vmatpush.bf16.msrb.mxu1 %v1555_v12 }
  0x7e   :  { %1024 = vmatpush.bf16.msrb.mxu2 %v1683_v13 }
  0x7f   :  { %1038 = vmatpush.bf16.msrb.mxu3 %v1811_v18 }
  0x80   :  { %997 = vmatpush.bf16.msrb.mxu0 %v1411_v24 }
  0x81   :  { %1011 = vmatpush.bf16.msrb.mxu1 %v1539_v25 }
  0x82   :  { %1025 = vmatpush.bf16.msrb.mxu2 %v1667_v26  ;;  %v2184_v26 = vld [vmem:[%s3163_s3 + $0x80] sm:$0xff] }
  0x83   :  { %1039 = vmatpush.bf16.msrb.mxu3 %v1795_v27  ;;  %998 = vmatmul.bf16.vlgmr.msrb.gmra.mxu0 %v2500_v1  ;;  %v2171_v1 = vld [vmem:[%s3163_s3 + $0x18] sm:$0xff] }
  0x84   :  { %1318 = vmatpush.bf16.msra.mxu0 %v2175_v28  ;;  %1012 = vmatmul.bf16.vlgmr.msrb.gmra.mxu1 %v2537_v17  ;;  %v2182_v17 = vld [vmem:[%s3163_s3 + $0x70] sm:$0xff]  ;;  %v2199_v28 = vld [vmem:[%s3163_s3 + $0xf8] sm:$0xff] }
  0x85   :  { %1026 = vmatmul.bf16.vlgmr.msrb.gmra.mxu2 %v2480_v57  ;;  %v2183_v57 = vld [vmem:[%s3163_s3 + $0x78] sm:$0xff] }
  0x86   :  { %1040 = vmatmul.bf16.vlgmr.msrb.gmra.mxu3 %v2502_v2  ;;  %1332 = vmatpush.bf16.msra.mxu1 %v2183_v57  ;;  %v2170_v2 = vld [vmem:[%s3163_s3 + $0x10] sm:$0xff]  ;;  %v2196_v57 = vld [vmem:[%s3163_s3 + $0xe0] sm:$0xff] }
  0x87   :  { %1346 = vmatpush.bf16.msra.mxu2 %v2191_v60  ;;  %1360 = vmatpush.bf16.msra.mxu3 %v2199_v28 }
  0x88   :  { %1319 = vmatpush.bf16.msra.mxu0 %v2174_v29 }
  0x8a   :  { %1333 = vmatpush.bf16.msra.mxu1 %v2182_v17 }
  0x8b   :  { %1347 = vmatpush.bf16.msra.mxu2 %v2190_v62 }
  0x8c   :  { %1320 = vmatpush.bf16.msra.mxu0 %v2173_v30  ;;  %v2198_v30 = vld [vmem:[%s3163_s3 + $0xf0] sm:$0xff] }
  0x8d   :  { %1361 = vmatpush.bf16.msra.mxu3 %v2198_v30 }
  0x8e   :  { %1334 = vmatpush.bf16.msra.mxu1 %v2181_v33 }
  0x8f   :  { %1348 = vmatpush.bf16.msra.mxu2 %v2189_v0 }
  0x90   :  { %1321 = vmatpush.bf16.msra.mxu0 %v2172_v31  ;;  %v2197_v31 = vld [vmem:[%s3163_s3 + $0xe8] sm:$0xff] }
  0x91   :  { %1362 = vmatpush.bf16.msra.mxu3 %v2197_v31 }
  0x92   :  { %1335 = vmatpush.bf16.msra.mxu1 %v2180_v39 }
  0x93   :  { %1349 = vmatpush.bf16.msra.mxu2 %v2188_v7 }
  0x94   :  { %1322 = vmatpush.bf16.msra.mxu0 %v2171_v1  ;;  %v156_v1 = vperm.slane %v3080_v34, 2 }
  0x95   :  { %1363 = vmatpush.bf16.msra.mxu3 %v2196_v57 }
  0x96   :  { %1336 = vmatpush.bf16.msra.mxu1 %v2179_v44 }
  0x97   :  { %1350 = vmatpush.bf16.msra.mxu2 %v2187_v10 }
  0x98   :  { %1323 = vmatpush.bf16.msra.mxu0 %v2170_v2 }
  0x9a   :  { %1337 = vmatpush.bf16.msra.mxu1 %v2178_v48 }
  0x9b   :  { %1351 = vmatpush.bf16.msra.mxu2 %v2186_v16 }
  0x9c   :  { %1324 = vmatpush.bf16.msra.mxu0 %v2169_v32 }
  0x9e   :  { %1338 = vmatpush.bf16.msra.mxu1 %v2177_v54  ;;  %v157_v54 = vperm.slane %v3080_v34, 3 }
  0x9f   :  { %1352 = vmatpush.bf16.msra.mxu2 %v2185_v21 }
  0xa0   :  { %1325 = vmatpush.bf16.msra.mxu0 %v2168_v36 }
  0xa2   :  { %1339 = vmatpush.bf16.msra.mxu1 %v2176_v59 }
  0xa3   :  { %v831_v37 = vpop.f32.mrf.mxu0  ;;  %1353 = vmatpush.bf16.msra.mxu2 %v2184_v26 }
  0xa4   :  { %v832_v38 = vadd.f32 %v831_v37, %v154_v35 }
  0xa7   :  { %v845_v40 = vpop.f32.mrf.mxu1 }
  0xa8   :  { %v846_v41 = vadd.f32 %v845_v40, %v832_v38  ;;  %v859_v42 = vpop.f32.mrf.mxu2  ;;  %v2194_v40 = vld [vmem:[%s3163_s3 + $0xd0] sm:$0xff] }
  0xaa   :  { %v860_v46 = vadd.f32 %v859_v42, %v846_v41 }
  0xab   :  { %v873_v43 = vpop.f32.mrf.mxu3  ;;  %v833_v45 = vpop.f32.mrf.mxu0 }
  0xac   :  { %v834_v47 = vadd.f32 %v833_v45, %v154_v35  ;;  %v874_v50 = vadd.f32 %v873_v43, %v860_v46  ;;  %v2195_v35 = vld [vmem:[%s3163_s3 + $0xd8] sm:$0xff]  ;;  %v2193_v45 = vld [vmem:[%s3163_s3 + $0xc8] sm:$0xff] }
  0xad   :  { %1364 = vmatpush.bf16.msra.mxu3 %v2195_v35 }
  0xae   :  { %v1046_v56 = vmax.f32 %v874_v50, 0.0 }
  0xaf   :  { %v847_v49 = vpop.f32.mrf.mxu1 }
  0xb0   :  { %v848_v51 = vadd.f32 %v847_v49, %v834_v47  ;;  %v861_v52 = vpop.f32.mrf.mxu2 }
  0xb1   :  { %1365 = vmatpush.bf16.msra.mxu3 %v2194_v40 }
  0xb2   :  { %v862_v55 = vadd.f32 %v861_v52, %v848_v51  ;;  %v2192_v51 = vld [vmem:[%s3163_s3 + $0xc0] sm:$0xff] }
  0xb3   :  { %v875_v53 = vpop.f32.mrf.mxu3 }
  0xb4   :  { %v876_v58 = vadd.f32 %v875_v53, %v862_v55 }
  0xb5   :  { %1366 = vmatpush.bf16.msra.mxu3 %v2193_v45 }
  0xb6   :  { %v1050_v61 = vmax.f32 %v876_v58, 0.0 }
  0xb8   :  { %v1054_v63 = vpack.c.bf16 %v1050_v61, %v1046_v56 }
  0xb9   :  { %1367 = vmatpush.bf16.msra.mxu3 %v2192_v51 }
  0xba   :  { %1326 = vmatmul.bf16.vlgmr.msra.gmra.mxu0 %v1054_v63 }
  0xc0   :  { %v887_v4 = vpop.f32.mrf.mxu0 }
  0xc1   :  { %v888_v5 = vadd.f32 %v887_v4, %v155_v3  ;;  %v901_v6 = vpop.f32.mrf.mxu1 }
  0xc3   :  { %v902_v8 = vadd.f32 %v901_v6, %v888_v5 }
  0xc8   :  { %v915_v9 = vpop.f32.mrf.mxu2  ;;  %v889_v13 = vpop.f32.mrf.mxu0 }
  0xc9   :  { %v929_v11 = vpop.f32.mrf.mxu3  ;;  %v916_v12 = vadd.f32 %v915_v9, %v902_v8  ;;  %v890_v14 = vadd.f32 %v889_v13, %v155_v3  ;;  %v903_v15 = vpop.f32.mrf.mxu1  ;;  %v2200_v13 = vld [vmem:[%s3164_s4] ss:$0 sm:$0xff] }
  0xcb   :  { %v904_v18 = vadd.f32 %v903_v15, %v890_v14  ;;  %v930_v19 = vadd.f32 %v929_v11, %v916_v12 }
  0xcd   :  { %v1047_v24 = vmax.f32 %v930_v19, 0.0 }
  0xd0   :  { %v917_v20 = vpop.f32.mrf.mxu2 }
  0xd1   :  { %v918_v22 = vadd.f32 %v917_v20, %v904_v18  ;;  %v931_v23 = vpop.f32.mrf.mxu3 }
  0xd3   :  { %v932_v25 = vadd.f32 %v931_v23, %v918_v22 }
  0xd5   :  { %v1051_v27 = vmax.f32 %v932_v25, 0.0 }
  0xd7   :  { %v1055_v29 = vpack.c.bf16 %v1051_v27, %v1047_v24 }
  0xd9   :  { %1340 = vmatmul.bf16.vlgmr.msra.gmra.mxu1 %v1055_v29 }
  0xe0   :  { %v943_v2 = vpop.f32.mrf.mxu0 }
  0xe1   :  { %v944_v17 = vadd.f32 %v943_v2, %v156_v1  ;;  %v957_v32 = vpop.f32.mrf.mxu1 }
  0xe3   :  { %v958_v33 = vadd.f32 %v957_v32, %v944_v17 }
  0xe8   :  { %v971_v36 = vpop.f32.mrf.mxu2  ;;  %v945_v39 = vpop.f32.mrf.mxu0 }
  0xe9   :  { %v985_v37 = vpop.f32.mrf.mxu3  ;;  %v972_v38 = vadd.f32 %v971_v36, %v958_v33  ;;  %v946_v41 = vadd.f32 %v945_v39, %v156_v1  ;;  %v959_v42 = vpop.f32.mrf.mxu1 }
  0xeb   :  { %v960_v43 = vadd.f32 %v959_v42, %v946_v41  ;;  %v986_v44 = vadd.f32 %v985_v37, %v972_v38 }
  0xed   :  { %v1048_v49 = vmax.f32 %v986_v44, 0.0 }
  0xf0   :  { %v973_v46 = vpop.f32.mrf.mxu2 }
  0xf1   :  { %v974_v47 = vadd.f32 %v973_v46, %v960_v43  ;;  %v987_v48 = vpop.f32.mrf.mxu3 }
  0xf3   :  { %v988_v50 = vadd.f32 %v987_v48, %v974_v47 }
  0xf5   :  { %v1052_v52 = vmax.f32 %v988_v50, 0.0 }
  0xf7   :  { %v1056_v53 = vpack.c.bf16 %v1052_v52, %v1048_v49 }
  0xf9   :  { %1354 = vmatmul.bf16.vlgmr.msra.gmra.mxu2 %v1056_v53 }
 0x100   :  { %v999_v55 = vpop.f32.mrf.mxu0 }
 0x101   :  { %v1013_v56 = vpop.f32.mrf.mxu1  ;;  %v1000_v58 = vadd.f32 %v999_v55, %v157_v54 }
 0x103   :  { %v1014_v60 = vadd.f32 %v1013_v56, %v1000_v58 }
 0x108   :  { %v1027_v59 = vpop.f32.mrf.mxu2  ;;  %v1001_v62 = vpop.f32.mrf.mxu0 }
 0x109   :  { %v1041_v61 = vpop.f32.mrf.mxu3  ;;  %v1002_v63 = vadd.f32 %v1001_v62, %v157_v54  ;;  %v1028_v0 = vadd.f32 %v1027_v59, %v1014_v60  ;;  %v1015_v3 = vpop.f32.mrf.mxu1 }
 0x10b   :  { %v1016_v4 = vadd.f32 %v1015_v3, %v1002_v63  ;;  %v1042_v6 = vadd.f32 %v1041_v61, %v1028_v0 }
 0x10d   :  { %v1049_v10 = vmax.f32 %v1042_v6, 0.0 }
 0x110   :  { %v1029_v5 = vpop.f32.mrf.mxu2 }
 0x111   :  { %v1030_v7 = vadd.f32 %v1029_v5, %v1016_v4  ;;  %v1043_v8 = vpop.f32.mrf.mxu3 }
 0x113   :  { %v1044_v9 = vadd.f32 %v1043_v8, %v1030_v7 }
 0x115   :  { %v1053_v11 = vmax.f32 %v1044_v9, 0.0 }
 0x117   :  { %v1057_v12 = vpack.c.bf16 %v1053_v11, %v1049_v10 }
 0x119   :  { %1368 = vmatmul.bf16.vlgmr.msra.gmra.mxu3 %v1057_v12 }
 0x137   :  { %v1327_v34 = vpop.f32.mrf.mxu0 }
 0x138   :  { %v1328_v16 = vadd.f32 %v2200_v13, %v1327_v34 }
 0x13f   :  { %v1329_v20 = vpop.f32.mrf.mxu0 }
 0x140   :  { %v1330_v24 = vadd.f32 %v2200_v13, %v1329_v20 }
 0x156   :  { %v1341_v14 = vpop.f32.mrf.mxu1 }
 0x157   :  { %v1342_v18 = vadd.f32 %v1341_v14, %v1328_v16 }
 0x15e   :  { %v1343_v23 = vpop.f32.mrf.mxu1 }
 0x15f   :  { %v1344_v26 = vadd.f32 %v1343_v23, %v1330_v24 }
 0x17c   :  { %v1355_v15 = vpop.f32.mrf.mxu2 }
 0x17d   :  { %v1356_v19 = vadd.f32 %v1355_v15, %v1342_v18 }
 0x184   :  { %v1357_v25 = vpop.f32.mrf.mxu2 }
 0x185   :  { %v1358_v27 = vadd.f32 %v1357_v25, %v1344_v26 }
 0x19c   :  { %v1369_v21 = vpop.f32.mrf.mxu3 }
 0x19d   :  { %v1370_v22 = vadd.f32 %v1369_v21, %v1356_v19 }
 0x19f   :  { %1374 = vst [vmem:[%s3166_s5] sm:$0xff] %v1370_v22 }
 0x1a4   :  { %v1371_v28 = vpop.f32.mrf.mxu3 }
 0x1a5   :  { %v1372_v29 = vadd.f32 %v1371_v28, %v1358_v27 }
 0x1a7   :  { %1375 = vst [vmem:[%s3166_s5 + $0x8] sm:$0xff] %v1372_v29 }

</bundles_post_ra>
